<compile_context>
chip_gen: v7x
topology: tpu7x:2x2x1
jax: 0.10.0
libtpu: 0.0.40
codegen_flags: <defaults>
</compile_context>

<pallas_src>
import functools

import jax
import jax.numpy as jnp
from jax.experimental import pallas as pl
from jax.experimental.pallas import tpu as pltpu

EPS = 1e-5


def _round_up(x, m):
    return (x + m - 1) // m * m


def _layernorm_1pass(y, gamma, beta, inv_h):
    # One-pass LN: both reductions issue back-to-back on the XLU; avoids a
    # second full VPU pass over the (tm, H) tile. y is f32.
    s1 = jnp.sum(y, axis=-1, keepdims=True)
    s2 = jnp.sum(y * y, axis=-1, keepdims=True)
    mu = s1 * inv_h
    var = s2 * inv_h - mu * mu
    return (y - mu) * jax.lax.rsqrt(var + EPS) * gamma + beta


def resnorm_kernel(x_ref, w1_ref, p1_ref, w2_ref, p2_ref, o_ref):
    # p*_ref rows: [0]=bias, [1]=gamma, [2]=beta
    H = x_ref.shape[-1]
    inv_h = 1.0 / H

    x = x_ref[...]  # keep native dtype so bf16 inputs take the bf16 MXU path

    # ---- layer 1: Linear -> ReLU -> LayerNorm (f32 accumulate / f32 LN) ----
    y = jnp.dot(x, w1_ref[...], preferred_element_type=jnp.float32)
    y = y + p1_ref[0:1, :].astype(jnp.float32)
    y = jnp.maximum(y, 0.0)
    y = _layernorm_1pass(y,
                         p1_ref[1:2, :].astype(jnp.float32),
                         p1_ref[2:3, :].astype(jnp.float32),
                         inv_h)

    # ---- layer 2: Linear -> ReLU -> LayerNorm ----
    y = jnp.dot(y.astype(w2_ref.dtype), w2_ref[...],
                preferred_element_type=jnp.float32)
    y = y + p2_ref[0:1, :].astype(jnp.float32)
    y = jnp.maximum(y, 0.0)
    y = _layernorm_1pass(y,
                         p2_ref[1:2, :].astype(jnp.float32),
                         p2_ref[2:3, :].astype(jnp.float32),
                         inv_h)

    # residual added in f32, single cast on the way out
    o_ref[...] = (x.astype(jnp.float32) + y).astype(o_ref.dtype)


@functools.partial(jax.jit, static_argnames=("tm",))
def resnorm_layer(x, w1, b1, g1, be1, w2, b2, g2, be2, *, tm=256):
    N, H = x.shape

    # Pack (bias, gamma, beta) per layer into one (3, H) block.
    p1 = jnp.stack([b1.reshape(H), g1.reshape(H), be1.reshape(H)], axis=0)
    p2 = jnp.stack([b2.reshape(H), g2.reshape(H), be2.reshape(H)], axis=0)

    # Row tile: large enough to amortize per-step pipeline overhead and fill
    # the MXU M-dim, never larger than the (padded) row count, aligned to the
    # sublane packing for the input dtype (8 rows f32, 16 rows bf16).
    row_align = 8 * (4 // max(1, x.dtype.itemsize))
    tm_eff = min(_round_up(tm, row_align), _round_up(N, row_align))
    n_pad = _round_up(N, tm_eff)
    xp = x if n_pad == N else jnp.pad(x, ((0, n_pad - N), (0, 0)))
    n_steps = n_pad // tm_eff

    row_spec = pl.BlockSpec((tm_eff, H), lambda i: (i, 0))
    mat_spec = pl.BlockSpec((H, H), lambda i: (0, 0))
    vec_spec = pl.BlockSpec((3, H), lambda i: (0, 0))
    # TODO(synk): on VMEM-tight configs (large H on v7x), single-buffer the
    # constant weight blocks via pipeline_mode=pl.Buffered(1).

    itemsize = x.dtype.itemsize
    w_itemsize = w1.dtype.itemsize
    cost = pl.CostEstimate(
        flops=4 * n_pad * H * H,                       # two H x H matmuls
        transcendentals=2 * n_pad,                     # two rsqrt per row
        bytes_accessed=(2 * n_pad * H * itemsize       # x in + out
                        + 2 * H * H * w_itemsize       # both weight matrices
                        + 6 * H * 4),                  # packed vectors
    )

    # VMEM budget: double-buffered weights + in/out row tiles + packed vectors
    # + slack; clamp into [32 MiB, 64 MiB].
    vmem_needed = (2 * 2 * H * H * w_itemsize
                   + 2 * 2 * tm_eff * H * itemsize
                   + 2 * 2 * 8 * max(H, 128) * 4
                   + (4 << 20))
    vmem_limit = int(min(max(vmem_needed, 32 << 20), 64 << 20))

    out = pl.pallas_call(
        resnorm_kernel,
        out_shape=jax.ShapeDtypeStruct((n_pad, H), x.dtype),
        grid_spec=pltpu.PrefetchScalarGridSpec(
            num_scalar_prefetch=0,
            grid=(n_steps,),
            in_specs=[row_spec, mat_spec, vec_spec, mat_spec, vec_spec],
            out_specs=row_spec,
        ),
        compiler_params=pltpu.CompilerParams(
            dimension_semantics=("parallel",),
            vmem_limit_bytes=vmem_limit,
        ),
        cost_estimate=cost,
    )(xp, w1, p1, w2, p2)

    return out[:N] if n_pad != N else out


def reference(x, w1, b1, g1, be1, w2, b2, g2, be2):
    def ln(y, g, b):
        mu = jnp.mean(y, -1, keepdims=True)
        var = jnp.mean((y - mu) ** 2, -1, keepdims=True)
        return (y - mu) / jnp.sqrt(var + EPS) * g + b
    y = jnp.maximum(x @ w1 + b1, 0.0)
    y = ln(y, g1, be1)
    y = jnp.maximum(y @ w2 + b2, 0.0)
    y = ln(y, g2, be2)
    return x + y


if __name__ == "__main__":
    # N intentionally not a multiple of the row tile to exercise the padding /
    # tail-slice path; H=128 keeps the hidden dim lane-aligned.
    N, H = 300, 128
    key = jax.random.PRNGKey(0)
    kx, kw1, kb1, kw2, kb2, kg1, kbe1, kg2, kbe2 = jax.random.split(key, 9)

    x = jax.random.normal(kx, (N, H), dtype=jnp.float32)
    scale = 1.0 / jnp.sqrt(jnp.float32(H))
    # Linear weights stored as (in, out); equivalent to torch weight.T
    w1 = jax.random.uniform(kw1, (H, H), jnp.float32, -scale, scale)
    b1 = jax.random.uniform(kb1, (H,), jnp.float32, -scale, scale)
    w2 = jax.random.uniform(kw2, (H, H), jnp.float32, -scale, scale)
    b2 = jax.random.uniform(kb2, (H,), jnp.float32, -scale, scale)
    # LayerNorm affine params (torch default is ones/zeros; use non-trivial values)
    g1 = 1.0 + 0.1 * jax.random.normal(kg1, (H,), jnp.float32)
    be1 = 0.1 * jax.random.normal(kbe1, (H,), jnp.float32)
    g2 = 1.0 + 0.1 * jax.random.normal(kg2, (H,), jnp.float32)
    be2 = 0.1 * jax.random.normal(kbe2, (H,), jnp.float32)

    out = resnorm_layer(x, w1, b1, g1, be1, w2, b2, g2, be2)
    out = jax.block_until_ready(out)

    ref = reference(x, w1, b1, g1, be1, w2, b2, g2, be2)
    assert out.shape == ref.shape, "shape mismatch vs reference"
    assert jnp.allclose(out, ref, atol=1e-4, rtol=1e-4), "mismatch vs reference"

    print("KERNEL_OK")
</pallas_src>

<mosaic_0001>
module attributes {stable_mosaic.version = 11 : i64} {
  func.func @resnorm_kernel(%arg0: i32, %arg1: memref<256x128xf32, #tpu.memory_space<vmem>>, %arg2: memref<128x128xf32, #tpu.memory_space<vmem>>, %arg3: memref<3x128xf32, #tpu.memory_space<vmem>>, %arg4: memref<128x128xf32, #tpu.memory_space<vmem>>, %arg5: memref<3x128xf32, #tpu.memory_space<vmem>>, %arg6: memref<256x128xf32, #tpu.memory_space<vmem>>) attributes {dimension_semantics = [#tpu.dimension_semantics<parallel>], iteration_bounds = array<i64: 2>, scalar_prefetch = 0 : i64, scratch_operands = 0 : i64, tpu.core_type = #tpu.core_type<tc>, window_params = [{transform_indices = @transform_0, window_bounds = array<i64: 256, 128>}, {pipeline_mode = #tpu.pipeline_mode<synchronous>, transform_indices = @transform_1, window_bounds = array<i64: 128, 128>}, {pipeline_mode = #tpu.pipeline_mode<synchronous>, transform_indices = @transform_2, window_bounds = array<i64: 3, 128>}, {pipeline_mode = #tpu.pipeline_mode<synchronous>, transform_indices = @transform_3, window_bounds = array<i64: 128, 128>}, {pipeline_mode = #tpu.pipeline_mode<synchronous>, transform_indices = @transform_4, window_bounds = array<i64: 3, 128>}, {transform_indices = @transform_5, window_bounds = array<i64: 256, 128>}]} {
    %c0 = arith.constant 0 : index
    %c0_0 = arith.constant 0 : index
    %0 = vector.load %arg1[%c0, %c0_0] : memref<256x128xf32, #tpu.memory_space<vmem>>, vector<256x128xf32>
    %c0_1 = arith.constant 0 : index
    %c0_2 = arith.constant 0 : index
    %1 = vector.load %arg2[%c0_1, %c0_2] : memref<128x128xf32, #tpu.memory_space<vmem>>, vector<128x128xf32>
    %cst = arith.constant dense<0.000000e+00> : vector<256x128xf32>
    %2 = tpu.matmul %0, %1, %cst {dimension_numbers = #tpu.dot_dimension_numbers<[1], [0], [0], [1], [0, 0, 1, 1], [], []>} : vector<256x128xf32>, vector<128x128xf32>, vector<256x128xf32> -> vector<256x128xf32>
    %c0_3 = arith.constant 0 : index
    %c0_4 = arith.constant 0 : index
    %3 = vector.load %arg3[%c0_3, %c0_4] : memref<3x128xf32, #tpu.memory_space<vmem>>, vector<1x128xf32>
    %4 = vector.broadcast %3 : vector<1x128xf32> to vector<256x128xf32>
    %5 = arith.addf %2, %4 : vector<256x128xf32>
    %cst_5 = arith.constant 0.000000e+00 : f32
    %6 = vector.broadcast %cst_5 : f32 to vector<256x128xf32>
    %7 = arith.maximumf %5, %6 : vector<256x128xf32>
    %c1 = arith.constant 1 : index
    %c0_6 = arith.constant 0 : index
    %8 = vector.load %arg3[%c1, %c0_6] : memref<3x128xf32, #tpu.memory_space<vmem>>, vector<1x128xf32>
    %c2 = arith.constant 2 : index
    %c0_7 = arith.constant 0 : index
    %9 = vector.load %arg3[%c2, %c0_7] : memref<3x128xf32, #tpu.memory_space<vmem>>, vector<1x128xf32>
    %cst_8 = arith.constant dense<0.000000e+00> : vector<256xf32>
    %10 = vector.multi_reduction <add>, %7, %cst_8 [1] : vector<256x128xf32> to vector<256xf32>
    %11 = vector.shape_cast %10 : vector<256xf32> to vector<256x1xf32>
    %12 = arith.mulf %7, %7 : vector<256x128xf32>
    %cst_9 = arith.constant dense<0.000000e+00> : vector<256xf32>
    %13 = vector.multi_reduction <add>, %12, %cst_9 [1] : vector<256x128xf32> to vector<256xf32>
    %14 = vector.shape_cast %13 : vector<256xf32> to vector<256x1xf32>
    %cst_10 = arith.constant 7.812500e-03 : f32
    %15 = vector.broadcast %cst_10 : f32 to vector<256x1xf32>
    %16 = arith.mulf %11, %15 : vector<256x1xf32>
    %cst_11 = arith.constant 7.812500e-03 : f32
    %17 = vector.broadcast %cst_11 : f32 to vector<256x1xf32>
    %18 = arith.mulf %14, %17 : vector<256x1xf32>
    %19 = arith.mulf %16, %16 : vector<256x1xf32>
    %20 = arith.subf %18, %19 : vector<256x1xf32>
    %21 = vector.broadcast %16 : vector<256x1xf32> to vector<256x128xf32>
    %22 = arith.subf %7, %21 : vector<256x128xf32>
    %cst_12 = arith.constant 9.99999974E-6 : f32
    %23 = vector.broadcast %cst_12 : f32 to vector<256x1xf32>
    %24 = arith.addf %20, %23 : vector<256x1xf32>
    %25 = math.rsqrt %24 : vector<256x1xf32>
    %26 = vector.broadcast %25 : vector<256x1xf32> to vector<256x128xf32>
    %27 = arith.mulf %22, %26 : vector<256x128xf32>
    %28 = vector.broadcast %8 : vector<1x128xf32> to vector<256x128xf32>
    %29 = arith.mulf %27, %28 : vector<256x128xf32>
    %30 = vector.broadcast %9 : vector<1x128xf32> to vector<256x128xf32>
    %31 = arith.addf %29, %30 : vector<256x128xf32>
    %c0_13 = arith.constant 0 : index
    %c0_14 = arith.constant 0 : index
    %32 = vector.load %arg4[%c0_13, %c0_14] : memref<128x128xf32, #tpu.memory_space<vmem>>, vector<128x128xf32>
    %cst_15 = arith.constant dense<0.000000e+00> : vector<256x128xf32>
    %33 = tpu.matmul %31, %32, %cst_15 {dimension_numbers = #tpu.dot_dimension_numbers<[1], [0], [0], [1], [0, 0, 1, 1], [], []>} : vector<256x128xf32>, vector<128x128xf32>, vector<256x128xf32> -> vector<256x128xf32>
    %c0_16 = arith.constant 0 : index
    %c0_17 = arith.constant 0 : index
    %34 = vector.load %arg5[%c0_16, %c0_17] : memref<3x128xf32, #tpu.memory_space<vmem>>, vector<1x128xf32>
    %35 = vector.broadcast %34 : vector<1x128xf32> to vector<256x128xf32>
    %36 = arith.addf %33, %35 : vector<256x128xf32>
    %cst_18 = arith.constant 0.000000e+00 : f32
    %37 = vector.broadcast %cst_18 : f32 to vector<256x128xf32>
    %38 = arith.maximumf %36, %37 : vector<256x128xf32>
    %c1_19 = arith.constant 1 : index
    %c0_20 = arith.constant 0 : index
    %39 = vector.load %arg5[%c1_19, %c0_20] : memref<3x128xf32, #tpu.memory_space<vmem>>, vector<1x128xf32>
    %c2_21 = arith.constant 2 : index
    %c0_22 = arith.constant 0 : index
    %40 = vector.load %arg5[%c2_21, %c0_22] : memref<3x128xf32, #tpu.memory_space<vmem>>, vector<1x128xf32>
    %cst_23 = arith.constant dense<0.000000e+00> : vector<256xf32>
    %41 = vector.multi_reduction <add>, %38, %cst_23 [1] : vector<256x128xf32> to vector<256xf32>
    %42 = vector.shape_cast %41 : vector<256xf32> to vector<256x1xf32>
    %43 = arith.mulf %38, %38 : vector<256x128xf32>
    %cst_24 = arith.constant dense<0.000000e+00> : vector<256xf32>
    %44 = vector.multi_reduction <add>, %43, %cst_24 [1] : vector<256x128xf32> to vector<256xf32>
    %45 = vector.shape_cast %44 : vector<256xf32> to vector<256x1xf32>
    %cst_25 = arith.constant 7.812500e-03 : f32
    %46 = vector.broadcast %cst_25 : f32 to vector<256x1xf32>
    %47 = arith.mulf %42, %46 : vector<256x1xf32>
    %cst_26 = arith.constant 7.812500e-03 : f32
    %48 = vector.broadcast %cst_26 : f32 to vector<256x1xf32>
    %49 = arith.mulf %45, %48 : vector<256x1xf32>
    %50 = arith.mulf %47, %47 : vector<256x1xf32>
    %51 = arith.subf %49, %50 : vector<256x1xf32>
    %52 = vector.broadcast %47 : vector<256x1xf32> to vector<256x128xf32>
    %53 = arith.subf %38, %52 : vector<256x128xf32>
    %cst_27 = arith.constant 9.99999974E-6 : f32
    %54 = vector.broadcast %cst_27 : f32 to vector<256x1xf32>
    %55 = arith.addf %51, %54 : vector<256x1xf32>
    %56 = math.rsqrt %55 : vector<256x1xf32>
    %57 = vector.broadcast %56 : vector<256x1xf32> to vector<256x128xf32>
    %58 = arith.mulf %53, %57 : vector<256x128xf32>
    %59 = vector.broadcast %39 : vector<1x128xf32> to vector<256x128xf32>
    %60 = arith.mulf %58, %59 : vector<256x128xf32>
    %61 = vector.broadcast %40 : vector<1x128xf32> to vector<256x128xf32>
    %62 = arith.addf %60, %61 : vector<256x128xf32>
    %63 = arith.addf %0, %62 : vector<256x128xf32>
    %c0_28 = arith.constant 0 : index
    %c0_29 = arith.constant 0 : index
    %64 = vector.load %arg6[%c0_28, %c0_29] : memref<256x128xf32, #tpu.memory_space<vmem>>, vector<256x128xf32>
    tpu.vector_store %arg6[%c0_28, %c0_29], %63 {strides = array<i32>} : memref<256x128xf32, #tpu.memory_space<vmem>>, vector<256x128xf32>,
    return
  }
  func.func @transform_0(%arg0: i32) -> (i32, i32) {
    %c0_i32 = arith.constant 0 : i32
    %c0_i32_0 = arith.constant 0 : i32
    return %arg0, %c0_i32 : i32, i32
  }
  func.func @transform_1(%arg0: i32) -> (i32, i32) {
    %c0_i32 = arith.constant 0 : i32
    %c0_i32_0 = arith.constant 0 : i32
    %c0_i32_1 = arith.constant 0 : i32
    return %c0_i32, %c0_i32_0 : i32, i32
  }
  func.func @transform_2(%arg0: i32) -> (i32, i32) {
    %c0_i32 = arith.constant 0 : i32
    %c0_i32_0 = arith.constant 0 : i32
    %c0_i32_1 = arith.constant 0 : i32
    return %c0_i32, %c0_i32_0 : i32, i32
  }
  func.func @transform_3(%arg0: i32) -> (i32, i32) {
    %c0_i32 = arith.constant 0 : i32
    %c0_i32_0 = arith.constant 0 : i32
    %c0_i32_1 = arith.constant 0 : i32
    return %c0_i32, %c0_i32_0 : i32, i32
  }
  func.func @transform_4(%arg0: i32) -> (i32, i32) {
    %c0_i32 = arith.constant 0 : i32
    %c0_i32_0 = arith.constant 0 : i32
    %c0_i32_1 = arith.constant 0 : i32
    return %c0_i32, %c0_i32_0 : i32, i32
  }
  func.func @transform_5(%arg0: i32) -> (i32, i32) {
    %c0_i32 = arith.constant 0 : i32
    %c0_i32_0 = arith.constant 0 : i32
    return %arg0, %c0_i32 : i32, i32
  }
}

</mosaic_0001>

<bundles_post_ra>
// kernel: resnorm_layer.1
= control target key start
LH: loop header
LB: loop body
LE: loop exit
PB: predicated region body
PF: predicated region fallthrough
CT: control target
= control target key end

     0   :  { %s2459_s18 = smov 0   ;;  %s3595_s0 = inlined_call_operand.vmem [shape: f32[512,128], index: 0, kind: input, shape index: {}]   ;;  %s3596_s1 = inlined_call_operand.vmem [shape: f32[128,128], index: 1, kind: input, shape index: {}]   ;;  %s3597_s2 = inlined_call_operand.vmem [shape: f32[3,128], index: 2, kind: input, shape index: {}]   ;;  %s3598_s3 = inlined_call_operand.vmem [shape: f32[128,128], index: 3, kind: input, shape index: {}]   ;;  %s3599_s4 = inlined_call_operand.vmem [shape: f32[3,128], index: 4, kind: input, shape index: {}]   ;;  %s3600_s5 = inlined_call_operand.vmem [shape: f32[512,128], index: 5, kind: output, shape index: {}]  }
   0x1 LB: > { %s1916_s19 = sadd.s32 4294967295, %s2427_s18   ;;  %p1920_p0 = scmp.ge.s32.totalorder %s2427_s18, 1  ;;  %s2427_s18 = sphi %s2459_s18, %s15_s18  }
   0x2   : > { %p188_p1 = scmp.lt.s32.totalorder %s2427_s18, 3 }
   0x4   : > { %p189_p2 = pnand %p1920_p0, %p188_p1 }
   0x5   : > { %v260_v0 = vld [vmem:[%s3596_s1] sm:$0xff] (!%p189_p2)  ;;  %v261_v1 = vld [vmem:[%s3596_s1 + $0x8] sm:$0xff] (!%p189_p2)  ;;  %v262_v2 = vld [vmem:[%s3596_s1 + $0x10] sm:$0xff] (!%p189_p2)  ;;  %s1921_s26 = sshll.u32 (!%p189_p2), %s1916_s19, 5 }
   0x6   : > { %192 = sbr.rel (%p189_p2) target bundleno = 937 (0x3a9), region = 40  ;;  %v2189_v3 = vpack.c.bf16 (!%p189_p2), %v261_v1, %v260_v0  ;;  %v263_v4 = vld [vmem:[%s3596_s1 + $0x18] sm:$0xff] (!%p189_p2)  ;;  %p217_p3 = scmp.lt.s32.totalorder (!%p189_p2), %s1921_s26, 63  ;;  %v264_v6 = vld [vmem:[%s3596_s1 + $0x20] sm:$0xff] (!%p189_p2)  ;;  %v265_v7 = vld [vmem:[%s3596_s1 + $0x28] sm:$0xff] (!%p189_p2) }
   0x7   : > { %v2193_v5 = vpack.c.bf16 (!%p189_p2), %v263_v4, %v262_v2  ;;  %v2197_v8 = vpack.c.bf16 (!%p189_p2), %v265_v7, %v264_v6  ;;  %v266_v9 = vld [vmem:[%s3596_s1 + $0x30] sm:$0xff] (!%p189_p2)  ;;  %v267_v10 = vld [vmem:[%s3596_s1 + $0x38] sm:$0xff] (!%p189_p2)  ;;  %v268_v13 = vld [vmem:[%s3596_s1 + $0x40] sm:$0xff] (!%p189_p2) }
   0x8   : > { %2190 = vmatprep.subr.bf16.mxu0 (!%p189_p2), %v2189_v3  ;;  %v2201_v12 = vpack.c.bf16 (!%p189_p2), %v267_v10, %v266_v9  ;;  %v269_v14 = vld [vmem:[%s3596_s1 + $0x48] sm:$0xff] (!%p189_p2)  ;;  %v270_v16 = vld [vmem:[%s3596_s1 + $0x50] sm:$0xff] (!%p189_p2)  ;;  %v271_v17 = vld [vmem:[%s3596_s1 + $0x58] sm:$0xff] (!%p189_p2) }
   0x9   : > { %2192 = vmatpush3.bf16.msra.mxu0 (!%p189_p2), %v2189_v3  ;;  %v2205_v15 = vpack.c.bf16 (!%p189_p2), %v269_v14, %v268_v13  ;;  %v2209_v18 = vpack.c.bf16 (!%p189_p2), %v271_v17, %v270_v16  ;;  %v272_v19 = vld [vmem:[%s3596_s1 + $0x60] sm:$0xff] (!%p189_p2)  ;;  %v273_v20 = vld [vmem:[%s3596_s1 + $0x68] sm:$0xff] (!%p189_p2)  ;;  %v274_v22 = vld [vmem:[%s3596_s1 + $0x70] sm:$0xff] (!%p189_p2) }
   0xa   : > { %2194 = vmatprep.subr.bf16.mxu0 (!%p189_p2), %v2193_v5  ;;  %v2213_v21 = vpack.c.bf16 (!%p189_p2), %v273_v20, %v272_v19  ;;  %v275_v23 = vld [vmem:[%s3596_s1 + $0x78] sm:$0xff] (!%p189_p2)  ;;  %v2560_v56 = vld [vmem:[%s3597_s2] ss:$0 sm:$0xff] (!%p189_p2)  ;;  %v1029_v63 = vld [vmem:[%s3598_s3 + $0x8] sm:$0xff] (!%p189_p2) }
   0xb   : > { %v2217_v24 = vpack.c.bf16 (!%p189_p2), %v275_v23, %v274_v22  ;;  %v1028_v62 = vld [vmem:[%s3598_s3] sm:$0xff] (!%p189_p2)  ;;  %v1031_v22 = vld [vmem:[%s3598_s3 + $0x18] sm:$0xff] (!%p189_p2) }
   0xc   : > { %v2221_v1 = vpack.c.bf16 (!%p189_p2), %v1029_v63, %v1028_v62 }
   0xd   : > { %s3602_s26 = smov (!%p217_p3, %s1921_s26), 63  ;;  %2196 = vmatpush3.bf16.msra.mxu0 %v2193_v5 }
   0xe   : > { %s1922_s8 = sshll.u32 %s3602_s26, 3  ;;  %2198 = vmatprep.subr.bf16.mxu0 %v2197_v8  ;;  %2222 = vmatprep.subr.bf16.mxu1 %v2221_v1 }
   0xf   : > { %s2499_s15 = scalar_lea.vmem %s3595_s0, %s1922_s8  ;;  %2224 = vmatpush3.bf16.msra.mxu1 %v2221_v1  ;;  %s3315_s14 = scalar_lea.vmem %s3600_s5, %s1922_s8 }
  0x10   : > { %v228_v11 = vld [vmem:[%s2499_s15] sm:$0xff]  ;;  %v229_v25 = vld [vmem:[%s2499_s15 + $0x8] sm:$0xff]  ;;  %v230_v26 = vld [vmem:[%s2499_s15 + $0x10] sm:$0xff] }
  0x11   : > { %2061 = vmatprep.mubr.f32.mxu0 %v228_v11  ;;  %2200 = vmatpush3.bf16.msra.mxu0 %v2197_v8  ;;  %v231_v27 = vld [vmem:[%s2499_s15 + $0x18] sm:$0xff]  ;;  %v232_v28 = vld [vmem:[%s2499_s15 + $0x20] sm:$0xff]  ;;  %v233_v29 = vld [vmem:[%s2499_s15 + $0x28] sm:$0xff] }
  0x12   : > { %2202 = vmatprep.subr.bf16.mxu0 %v2201_v12  ;;  %v234_v30 = vld [vmem:[%s2499_s15 + $0x30] sm:$0xff]  ;;  %v235_v31 = vld [vmem:[%s2499_s15 + $0x38] sm:$0xff]  ;;  %v236_v32 = vld [vmem:[%s2499_s15 + $0x40] sm:$0xff] }
  0x13   : > { %v237_v33 = vld [vmem:[%s2499_s15 + $0x48] sm:$0xff]  ;;  %v238_v34 = vld [vmem:[%s2499_s15 + $0x50] sm:$0xff]  ;;  %v239_v35 = vld [vmem:[%s2499_s15 + $0x58] sm:$0xff] }
  0x14   : > { %v240_v36 = vld [vmem:[%s2499_s15 + $0x60] sm:$0xff]  ;;  %v241_v37 = vld [vmem:[%s2499_s15 + $0x68] sm:$0xff]  ;;  %v242_v38 = vld [vmem:[%s2499_s15 + $0x70] sm:$0xff] }
  0x15   : > { %2204 = vmatpush3.bf16.msra.mxu0 %v2201_v12  ;;  %v243_v39 = vld [vmem:[%s2499_s15 + $0x78] sm:$0xff]  ;;  %v244_v40 = vld [vmem:[%s2499_s15 + $0x80] sm:$0xff]  ;;  %v245_v41 = vld [vmem:[%s2499_s15 + $0x88] sm:$0xff] }
  0x16   : > { %2206 = vmatprep.subr.bf16.mxu0 %v2205_v15  ;;  %v246_v42 = vld [vmem:[%s2499_s15 + $0x90] sm:$0xff]  ;;  %v247_v43 = vld [vmem:[%s2499_s15 + $0x98] sm:$0xff]  ;;  %v248_v44 = vld [vmem:[%s2499_s15 + $0xa0] sm:$0xff] }
  0x17   : > { %v249_v45 = vld [vmem:[%s2499_s15 + $0xa8] sm:$0xff]  ;;  %v250_v46 = vld [vmem:[%s2499_s15 + $0xb0] sm:$0xff]  ;;  %v251_v47 = vld [vmem:[%s2499_s15 + $0xb8] sm:$0xff] }
  0x18   : > { %v252_v48 = vld [vmem:[%s2499_s15 + $0xc0] sm:$0xff]  ;;  %v253_v49 = vld [vmem:[%s2499_s15 + $0xc8] sm:$0xff]  ;;  %v254_v50 = vld [vmem:[%s2499_s15 + $0xd0] sm:$0xff] }
  0x19   : > { %2208 = vmatpush3.bf16.msra.mxu0 %v2205_v15  ;;  %v255_v51 = vld [vmem:[%s2499_s15 + $0xd8] sm:$0xff]  ;;  %v256_v52 = vld [vmem:[%s2499_s15 + $0xe0] sm:$0xff]  ;;  %v257_v53 = vld [vmem:[%s2499_s15 + $0xe8] sm:$0xff] }
  0x1a   : > { %2210 = vmatprep.subr.bf16.mxu0 %v2209_v18  ;;  %v258_v54 = vld [vmem:[%s2499_s15 + $0xf0] sm:$0xff]  ;;  %v259_v55 = vld [vmem:[%s2499_s15 + $0xf8] sm:$0xff] }
  0x1d   : > { %2212 = vmatpush3.bf16.msra.mxu0 %v2209_v18 }
  0x1e   : > { %2214 = vmatprep.subr.bf16.mxu0 %v2213_v21 }
  0x21   : > { %2216 = vmatpush3.bf16.msra.mxu0 %v2213_v21  ;;  %v1030_v21 = vld [vmem:[%s3598_s3 + $0x10] sm:$0xff] }
  0x22   : > { %2218 = vmatprep.subr.bf16.mxu0 %v2217_v24 }
  0x25   : > { %2220 = vmatpush3.bf16.msra.mxu0 %v2217_v24  ;;  %v2225_v24 = vpack.c.bf16 %v1031_v22, %v1030_v21 }
  0x27   : > { %2226 = vmatprep.subr.bf16.mxu1 %v2225_v24 }
  0x28   : > { %2062 = vmatmul.mubr.f32.vlgmr.msra.gmra.mrb[0].mxu0 %v229_v25  ;;  %2228 = vmatpush3.bf16.msra.mxu1 %v2225_v24 }
  0x29   : > { %2064 = vmatprep.mubr.f32.mxu0 %v230_v26 }
  0x2c   : > { %2065 = vmatmul.mubr.f32.gmra.mrb[2].mxu0 %v231_v27 }
  0x2d   : > { %2067 = vmatprep.mubr.f32.mxu0 %v232_v28 }
  0x30   : > { %2068 = vmatmul.mubr.f32.gmra.mrb[4].mxu0 %v233_v29  ;;  %v1032_v29 = vld [vmem:[%s3598_s3 + $0x20] sm:$0xff] }
  0x31   : > { %2070 = vmatprep.mubr.f32.mxu0 %v234_v30  ;;  %v1033_v30 = vld [vmem:[%s3598_s3 + $0x28] sm:$0xff] }
  0x34   : > { %2071 = vmatmul.mubr.f32.gmra.mrb[6].mxu0 %v235_v31 }
  0x35   : > { %2073 = vmatprep.mubr.f32.mxu0 %v236_v32  ;;  %v2229_v32 = vpack.c.bf16 %v1033_v30, %v1032_v29 }
  0x37   : > { %2230 = vmatprep.subr.bf16.mxu1 %v2229_v32 }
  0x38   : > { %2074 = vmatmul.mubr.f32.gmra.mrb[8].mxu0 %v237_v33  ;;  %2232 = vmatpush3.bf16.msra.mxu1 %v2229_v32 }
  0x39   : > { %2076 = vmatprep.mubr.f32.mxu0 %v238_v34 }
  0x3c   : > { %2077 = vmatmul.mubr.f32.gmra.mrb[10].mxu0 %v239_v35 }
  0x3d   : > { %2079 = vmatprep.mubr.f32.mxu0 %v240_v36 }
  0x40   : > { %2080 = vmatmul.mubr.f32.gmra.mrb[12].mxu0 %v241_v37  ;;  %v1034_v37 = vld [vmem:[%s3598_s3 + $0x30] sm:$0xff] }
  0x41   : > { %2082 = vmatprep.mubr.f32.mxu0 %v242_v38  ;;  %v1035_v38 = vld [vmem:[%s3598_s3 + $0x38] sm:$0xff] }
  0x44   : > { %2083 = vmatmul.mubr.f32.gmra.mrb[14].mxu0 %v243_v39 }
  0x45   : > { %2085 = vmatprep.mubr.f32.mxu0 %v244_v40  ;;  %v2233_v40 = vpack.c.bf16 %v1035_v38, %v1034_v37 }
  0x47   : > { %2234 = vmatprep.subr.bf16.mxu1 %v2233_v40 }
  0x48   : > { %2086 = vmatmul.mubr.f32.gmra.mrb[16].mxu0 %v245_v41  ;;  %2236 = vmatpush3.bf16.msra.mxu1 %v2233_v40 }
  0x49   : > { %2088 = vmatprep.mubr.f32.mxu0 %v246_v42 }
  0x4c   : > { %2089 = vmatmul.mubr.f32.gmra.mrb[18].mxu0 %v247_v43 }
  0x4d   : > { %2091 = vmatprep.mubr.f32.mxu0 %v248_v44 }
  0x50   : > { %2092 = vmatmul.mubr.f32.gmra.mrb[20].mxu0 %v249_v45  ;;  %v1036_v45 = vld [vmem:[%s3598_s3 + $0x40] sm:$0xff] }
  0x51   : > { %2094 = vmatprep.mubr.f32.mxu0 %v250_v46  ;;  %v1037_v46 = vld [vmem:[%s3598_s3 + $0x48] sm:$0xff] }
  0x54   : > { %2095 = vmatmul.mubr.f32.gmra.mrb[22].mxu0 %v251_v47 }
  0x55   : > { %2097 = vmatprep.mubr.f32.mxu0 %v252_v48  ;;  %v2237_v48 = vpack.c.bf16 %v1037_v46, %v1036_v45 }
  0x57   : > { %2238 = vmatprep.subr.bf16.mxu1 %v2237_v48 }
  0x58   : > { %2098 = vmatmul.mubr.f32.gmra.mrb[24].mxu0 %v253_v49  ;;  %2240 = vmatpush3.bf16.msra.mxu1 %v2237_v48 }
  0x59   : > { %2100 = vmatprep.mubr.f32.mxu0 %v254_v50 }
  0x5c   : > { %2101 = vmatmul.mubr.f32.gmra.mrb[26].mxu0 %v255_v51 }
  0x5d   : > { %2103 = vmatprep.mubr.f32.mxu0 %v256_v52 }
  0x60   : > { %2104 = vmatmul.mubr.f32.gmra.mrb[28].mxu0 %v257_v53 }
  0x61   : > { %2106 = vmatprep.mubr.f32.mxu0 %v258_v54 }
  0x64   : > { %2107 = vmatmul.mubr.f32.gmra.mrb[30].mxu0 %v259_v55 }
  0xfb   : > { %v2063_v57 = vpop.f32.mrb[0].mxu0 }
  0xfc   : > { %v353_v58 = vadd.f32 %v2063_v57, %v2560_v56  ;;  %v347_v59 = vpop.f32.mrb[1].mxu0  ;;  %v1038_v57 = vld [vmem:[%s3598_s3 + $0x50] sm:$0xff] }
  0xfd   : > { %v348_v60 = vadd.f32 %v2560_v56, %v347_v59 }
  0xfe   : > { %v2564_v61 = vmax.f32 %v353_v58, 0.0  ;;  %v1039_v58 = vld [vmem:[%s3598_s3 + $0x58] sm:$0xff] }
  0xff   : > { %v2066_v0 = vpop.f32.mrb[2].mxu0  ;;  %v2572_v2 = vmax.f32 %v348_v60, 0.0  ;;  %v2241_v60 = vpack.c.bf16 %v1039_v58, %v1038_v57 }
 0x100   : > { %542 = vadd.xlane.f32.xlu0 %v2564_v61  ;;  %v605_v3 = vmul.f32 %v2564_v61, %v2564_v61  ;;  %v357_v4 = vpop.f32.mrb[3].mxu0  ;;  %v363_v6 = vadd.f32 %v2066_v0, %v2560_v56 }
 0x101   : > { %v358_v5 = vadd.f32 %v2560_v56, %v357_v4  ;;  %v604_v9 = vmul.f32 %v2572_v2, %v2572_v2  ;;  %2242 = vmatprep.subr.bf16.mxu1 %v2241_v60 }
 0x102   : > { %638 = vadd.xlane.f32.xlu1 %v605_v3  ;;  %v2584_v11 = vmax.f32 %v363_v6, 0.0  ;;  %2244 = vmatpush3.bf16.msra.mxu1 %v2241_v60  ;;  %v1041_v6 = vld [vmem:[%s3598_s3 + $0x68] sm:$0xff] }
 0x103   : > { %v2069_v7 = vpop.f32.mrb[4].mxu0  ;;  %v2579_v8 = vmax.f32 %v358_v5, 0.0  ;;  %v1040_v5 = vld [vmem:[%s3598_s3 + $0x60] sm:$0xff] }
 0x104   : > { %540 = vadd.xlane.f32.xlu0 %v2572_v2  ;;  %v367_v10 = vpop.f32.mrb[5].mxu0  ;;  %v373_v16 = vadd.f32 %v2069_v7, %v2560_v56  ;;  %v607_v19 = vmul.f32 %v2584_v11, %v2584_v11 }
 0x105   : > { %v368_v13 = vadd.f32 %v2560_v56, %v367_v10  ;;  %v606_v14 = vmul.f32 %v2579_v8, %v2579_v8 }
 0x106   : > { %636 = vadd.xlane.f32.xlu1 %v604_v9  ;;  %v2602_v23 = vmax.f32 %v373_v16, 0.0  ;;  %v2245_v9 = vpack.c.bf16 %v1041_v6, %v1040_v5 }
 0x107   : > { %v2072_v12 = vpop.f32.mrb[6].mxu0  ;;  %v2592_v18 = vmax.f32 %v368_v13, 0.0 }
 0x108   : > { %544 = vadd.xlane.f32.xlu0 %v2579_v8  ;;  %v377_v15 = vpop.f32.mrb[7].mxu0  ;;  %v383_v31 = vadd.f32 %v2072_v12, %v2560_v56  ;;  %v609_v35 = vmul.f32 %v2602_v23, %v2602_v23  ;;  %2246 = vmatprep.subr.bf16.mxu1 %v2245_v9 }
 0x109   : > { %v378_v26 = vadd.f32 %v2560_v56, %v377_v15  ;;  %v608_v27 = vmul.f32 %v2592_v18, %v2592_v18  ;;  %2248 = vmatpush3.bf16.msra.mxu1 %v2245_v9 }
 0x10a   : > { %546 = vadd.xlane.f32.xlu1 %v2584_v11  ;;  %v2630_v39 = vmax.f32 %v383_v31, 0.0 }
 0x10b   : > { %v2075_v17 = vpop.f32.mrb[8].mxu0  ;;  %v2618_v34 = vmax.f32 %v378_v26, 0.0 }
 0x10c   : > { %640 = vadd.xlane.f32.xlu0 %v606_v14  ;;  %v387_v20 = vpop.f32.mrb[9].mxu0  ;;  %v393_v47 = vadd.f32 %v2075_v17, %v2560_v56  ;;  %v611_v51 = vmul.f32 %v2630_v39, %v2630_v39  ;;  %v1042_v17 = vld [vmem:[%s3598_s3 + $0x70] sm:$0xff] }
 0x10d   : > { %v388_v42 = vadd.f32 %v2560_v56, %v387_v20  ;;  %v610_v43 = vmul.f32 %v2618_v34, %v2618_v34 }
 0x10e   : > { %642 = vadd.xlane.f32.xlu1 %v607_v19  ;;  %v2658_v55 = vmax.f32 %v393_v47, 0.0  ;;  %v1043_v19 = vld [vmem:[%s3598_s3 + $0x78] sm:$0xff] }
 0x10f   : > { %v2078_v25 = vpop.f32.mrb[10].mxu0  ;;  %v2648_v50 = vmax.f32 %v388_v42, 0.0  ;;  %v2249_v21 = vpack.c.bf16 %v1043_v19, %v1042_v17 }
 0x110   : > { %548 = vadd.xlane.f32.xlu0 %v2592_v18  ;;  %v397_v28 = vpop.f32.mrb[11].mxu0  ;;  %v403_v4 = vadd.f32 %v2078_v25, %v2560_v56  ;;  %v613_v12 = vmul.f32 %v2658_v55, %v2658_v55 }
 0x111   : > { %v398_v62 = vadd.f32 %v2560_v56, %v397_v28  ;;  %v612_v63 = vmul.f32 %v2648_v50, %v2648_v50  ;;  %2250 = vmatprep.subr.bf16.mxu1 %v2249_v21 }
 0x112   : > { %550 = vadd.xlane.f32.xlu1 %v2602_v23  ;;  %v2694_v16 = vmax.f32 %v403_v4, 0.0  ;;  %2252 = vmatpush3.bf16.msra.mxu1 %v2249_v21 }
 0x113   : > { %v2616_v33 = vpop.f32.mrb[12].mxu0  ;;  %v2684_v10 = vmax.f32 %v398_v62, 0.0 }
 0x114   : > { %644 = vadd.xlane.f32.xlu0 %v608_v27  ;;  %v2622_v36 = vpop.f32.mrb[13].mxu0  ;;  %v413_v28 = vadd.f32 %v2616_v33, %v2560_v56  ;;  %v615_v31 = vmul.f32 %v2694_v16, %v2694_v16 }
 0x115   : > { %v408_v22 = vadd.f32 %v2560_v56, %v2622_v36  ;;  %v614_v24 = vmul.f32 %v2684_v10, %v2684_v10 }
 0x116   : > { %646 = vadd.xlane.f32.xlu1 %v609_v35  ;;  %v2722_v37 = vmax.f32 %v413_v28, 0.0 }
 0x117   : > { %v2632_v41 = vpop.f32.mrb[14].mxu0  ;;  %v2714_v30 = vmax.f32 %v408_v22, 0.0 }
 0x118   : > { %552 = vadd.xlane.f32.xlu0 %v2618_v34  ;;  %v2638_v44 = vpop.f32.mrb[15].mxu0  ;;  %v423_v46 = vadd.f32 %v2632_v41, %v2560_v56 }
 0x119   : > { %v418_v38 = vadd.f32 %v2560_v56, %v2638_v44  ;;  %v616_v40 = vmul.f32 %v2714_v30, %v2714_v30  ;;  %v617_v44 = vmul.f32 %v2722_v37, %v2722_v37 }
 0x11a   : > { %554 = vadd.xlane.f32.xlu1 %v2630_v39  ;;  %v2744_v57 = vmax.f32 %v423_v46, 0.0 }
 0x11b   : > { %v2087_v49 = vpop.f32.mrb[16].mxu0  ;;  %v2736_v48 = vmax.f32 %v418_v38, 0.0 }
 0x11c   : > { %648 = vadd.xlane.f32.xlu0 %v610_v43  ;;  %v2653_v52 = vadd.f32 %v2087_v49, %v2560_v56  ;;  %v427_v53 = vpop.f32.mrb[17].mxu0 }
 0x11d   : > { %v2656_v54 = vadd.f32 %v2560_v56, %v427_v53  ;;  %v618_v41 = vmul.f32 %v2736_v48, %v2736_v48 }
 0x11e   : > { %650 = vadd.xlane.f32.xlu1 %v611_v51  ;;  %v2760_v4 = vmax.f32 %v2653_v52, 0.0 }
 0x11f   : > { %v2090_v59 = vpop.f32.mrb[18].mxu0 }
 0x120   : > { %556 = vadd.xlane.f32.xlu0 %v2648_v50  ;;  %v2671_v0 = vadd.f32 %v2090_v59, %v2560_v56  ;;  %v437_v1 = vpop.f32.mrb[19].mxu0 }
 0x121   : > { %v2674_v3 = vadd.f32 %v2560_v56, %v437_v1  ;;  %v619_v1 = vmul.f32 %v2744_v57, %v2744_v57 }
 0x122   : > { %558 = vadd.xlane.f32.xlu1 %v2658_v55  ;;  %v2772_v6 = vmax.f32 %v2671_v0, 0.0 }
 0x123   : > { %v2093_v7 = vpop.f32.mrb[20].mxu0 }
 0x124   : > { %652 = vadd.xlane.f32.xlu0 %v612_v63  ;;  %v2689_v13 = vadd.f32 %v2093_v7, %v2560_v56  ;;  %v447_v14 = vpop.f32.mrb[21].mxu0  ;;  %v2755_v63 = vmax.f32 %v2656_v54, 0.0  ;;  %v621_v54 = vmul.f32 %v2760_v4, %v2760_v4 }
 0x125   : > { %v2692_v15 = vadd.f32 %v2560_v56, %v447_v14 }
 0x126   : > { %654 = vadd.xlane.f32.xlu1 %v613_v12  ;;  %v620_v5 = vmul.f32 %v2755_v63, %v2755_v63  ;;  %v2784_v9 = vmax.f32 %v2689_v13, 0.0 }
 0x127   : > { %v2096_v20 = vpop.f32.mrb[22].mxu0  ;;  %v2779_v7 = vmax.f32 %v2692_v15, 0.0 }
 0x128   : > { %560 = vadd.xlane.f32.xlu0 %v2684_v10  ;;  %v2708_v25 = vadd.f32 %v2096_v20, %v2560_v56  ;;  %v457_v26 = vpop.f32.mrb[23].mxu0  ;;  %v625_v14 = vmul.f32 %v2784_v9, %v2784_v9 }
 0x129   : > { %v458_v27 = vadd.f32 %v2560_v56, %v457_v26  ;;  %v624_v0 = vmul.f32 %v2779_v7, %v2779_v7 }
 0x12a   : > { %562 = vadd.xlane.f32.xlu1 %v2694_v16  ;;  %v2795_v15 = vmax.f32 %v2708_v25, 0.0 }
 0x12b   : > { %v2099_v29 = vpop.f32.mrb[24].mxu0  ;;  %v2790_v12 = vmax.f32 %v458_v27, 0.0 }
 0x12c   : > { %656 = vadd.xlane.f32.xlu0 %v614_v24  ;;  %v2719_v32 = vadd.f32 %v2099_v29, %v2560_v56  ;;  %v467_v35 = vpop.f32.mrb[25].mxu0  ;;  %v627_v19 = vmul.f32 %v2795_v15, %v2795_v15 }
 0x12d   : > { %v468_v36 = vadd.f32 %v2560_v56, %v467_v35  ;;  %v626_v13 = vmul.f32 %v2790_v12, %v2790_v12 }
 0x12e   : > { %658 = vadd.xlane.f32.xlu1 %v615_v31  ;;  %v2806_v20 = vmax.f32 %v2719_v32, 0.0 }
 0x12f   : > { %v2102_v33 = vpop.f32.mrb[26].mxu0  ;;  %v2801_v17 = vmax.f32 %v468_v36, 0.0 }
 0x130   : > { %564 = vadd.xlane.f32.xlu0 %v2714_v30  ;;  %v2730_v42 = vadd.f32 %v2102_v33, %v2560_v56  ;;  %v477_v43 = vpop.f32.mrb[27].mxu0  ;;  %v629_v24 = vmul.f32 %v2806_v20, %v2806_v20 }
 0x131   : > { %v478_v45 = vadd.f32 %v2560_v56, %v477_v43  ;;  %v628_v21 = vmul.f32 %v2801_v17, %v2801_v17 }
 0x132   : > { %566 = vadd.xlane.f32.xlu1 %v2722_v37  ;;  %v2817_v25 = vmax.f32 %v2730_v42, 0.0 }
 0x133   : > { %v2105_v47 = vpop.f32.mrb[28].mxu0  ;;  %v2812_v22 = vmax.f32 %v478_v45, 0.0 }
 0x134   : > { %660 = vadd.xlane.f32.xlu0 %v616_v40  ;;  %v2741_v49 = vadd.f32 %v2105_v47, %v2560_v56  ;;  %v487_v51 = vpop.f32.mrb[29].mxu0  ;;  %v631_v28 = vmul.f32 %v2817_v25, %v2817_v25 }
 0x135   : > { %v488_v53 = vadd.f32 %v2560_v56, %v487_v51  ;;  %v630_v26 = vmul.f32 %v2812_v22, %v2812_v22 }
 0x136   : > { %662 = vadd.xlane.f32.xlu1 %v617_v44  ;;  %v2828_v29 = vmax.f32 %v2741_v49, 0.0 }
 0x137   : > { %v2108_v58 = vpop.f32.mrb[30].mxu0  ;;  %v2823_v27 = vmax.f32 %v488_v53, 0.0 }
 0x138   : > { %568 = vadd.xlane.f32.xlu0 %v2736_v48  ;;  %v2750_v59 = vadd.f32 %v2108_v58, %v2560_v56  ;;  %v497_v60 = vpop.f32.mrb[31].mxu0  ;;  %v633_v35 = vmul.f32 %v2828_v29, %v2828_v29 }
 0x139   : > { %v498_v62 = vadd.f32 %v2560_v56, %v497_v60  ;;  %v2767_v56 = vmax.f32 %v2674_v3, 0.0  ;;  %v623_v3 = vmul.f32 %v2772_v6, %v2772_v6  ;;  %v632_v31 = vmul.f32 %v2823_v27, %v2823_v27 }
 0x13a   : > { %570 = vadd.xlane.f32.xlu1 %v2744_v57  ;;  %v2839_v36 = vmax.f32 %v2750_v59, 0.0 }
 0x13b   : > { %v622_v52 = vmul.f32 %v2767_v56, %v2767_v56  ;;  %v2834_v32 = vmax.f32 %v498_v62, 0.0 }
 0x13c   : > { %664 = vadd.xlane.f32.xlu0 %v618_v41  ;;  %v635_v38 = vmul.f32 %v2839_v36, %v2839_v36 }
 0x13d   : > { %v634_v33 = vmul.f32 %v2834_v32, %v2834_v32 }
 0x13e   : > { %666 = vadd.xlane.f32.xlu1 %v619_v1 }
 0x140   : > { %572 = vadd.xlane.f32.xlu0 %v2755_v63 }
 0x142   : > { %574 = vadd.xlane.f32.xlu1 %v2760_v4 }
 0x144   : > { %668 = vadd.xlane.f32.xlu0 %v620_v5 }
 0x146   : > { %670 = vadd.xlane.f32.xlu1 %v621_v54 }
 0x148   : > { %576 = vadd.xlane.f32.xlu0 %v2767_v56 }
 0x14a   : > { %578 = vadd.xlane.f32.xlu1 %v2772_v6 }
 0x14c   : > { %672 = vadd.xlane.f32.xlu0 %v622_v52 }
 0x14e   : > { %674 = vadd.xlane.f32.xlu1 %v623_v3 }
 0x150   : > { %580 = vadd.xlane.f32.xlu0 %v2779_v7 }
 0x152   : > { %582 = vadd.xlane.f32.xlu1 %v2784_v9 }
 0x154   : > { %676 = vadd.xlane.f32.xlu0 %v624_v0 }
 0x156   : > { %678 = vadd.xlane.f32.xlu1 %v625_v14 }
 0x158   : > { %584 = vadd.xlane.f32.xlu0 %v2790_v12 }
 0x15a   : > { %586 = vadd.xlane.f32.xlu1 %v2795_v15 }
 0x15c   : > { %680 = vadd.xlane.f32.xlu0 %v626_v13 }
 0x15e   : > { %682 = vadd.xlane.f32.xlu1 %v627_v19 }
 0x160   : > { %588 = vadd.xlane.f32.xlu0 %v2801_v17 }
 0x162   : > { %590 = vadd.xlane.f32.xlu1 %v2806_v20 }
 0x164   : > { %684 = vadd.xlane.f32.xlu0 %v628_v21 }
 0x166   : > { %686 = vadd.xlane.f32.xlu1 %v629_v24 }
 0x168   : > { %592 = vadd.xlane.f32.xlu0 %v2812_v22 }
 0x16a   : > { %594 = vadd.xlane.f32.xlu1 %v2817_v25 }
 0x16c   : > { %688 = vadd.xlane.f32.xlu0 %v630_v26 }
 0x16e   : > { %690 = vadd.xlane.f32.xlu1 %v631_v28 }
 0x170   : > { %596 = vadd.xlane.f32.xlu0 %v2823_v27 }
 0x172   : > { %598 = vadd.xlane.f32.xlu1 %v2828_v29 }
 0x174   : > { %692 = vadd.xlane.f32.xlu0 %v632_v31 }
 0x176   : > { %694 = vadd.xlane.f32.xlu1 %v633_v35 }
 0x178   : > { %600 = vadd.xlane.f32.xlu0 %v2834_v32 }
 0x17a   : > { %602 = vadd.xlane.f32.xlu1 %v2839_v36 }
 0x17c   : > { %696 = vadd.xlane.f32.xlu0 %v634_v33 }
 0x17e   : > { %698 = vadd.xlane.f32.xlu1 %v635_v38 }
 0x18d   : > { %v543_v40 = vpop.xlane.xlu0 %542 }
 0x18e   : > { %v701_v42 = vmul.f32 0.0078125, %v543_v40 }
 0x18f   : > { %v639_v43 = vpop.xlane.xlu1 %638 }
 0x190   : > { %v765_v45 = vmul.f32 %v701_v42, %v701_v42  ;;  %v733_v46 = vmul.f32 0.0078125, %v639_v43  ;;  %v829_v38 = vsub.f32 %v2564_v61, %v701_v42 }
 0x191   : > { %v541_v47 = vpop.xlane.xlu0 %540 }
 0x192   : > { %v797_v44 = vsub.f32 %v733_v46, %v765_v45  ;;  %v700_v49 = vmul.f32 0.0078125, %v541_v47 }
 0x193   : > { %v637_v51 = vpop.xlane.xlu1 %636 }
 0x194   : > { %v861_v53 = vadd.f32 1e-05, %v797_v44  ;;  %v764_v58 = vmul.f32 %v700_v49, %v700_v49  ;;  %v732_v41 = vmul.f32 0.0078125, %v637_v51  ;;  %v828_v51 = vsub.f32 %v2572_v2, %v700_v49 }
 0x195   : > { %v545_v59 = vpop.xlane.xlu0 %544 }
 0x196   : > { %2261 = vrsqrt.f32 %v861_v53  ;;  %v796_v60 = vsub.f32 %v732_v41, %v764_v58  ;;  %v702_v62 = vmul.f32 0.0078125, %v545_v59  ;;  %v2858_v58 = vld [vmem:[%s3597_s2 + $0x1] ss:$0 sm:$0xff] }
 0x197   : > { %v547_v1 = vpop.xlane.xlu1 %546 }
 0x198   : > { %v860_v5 = vadd.f32 1e-05, %v796_v60  ;;  %v766_v54 = vmul.f32 %v702_v62, %v702_v62  ;;  %v703_v52 = vmul.f32 0.0078125, %v547_v1 }
 0x199   : > { %v641_v3 = vpop.xlane.xlu0 %640 }
 0x19a   : > { %2263 = vrsqrt.f32 %v860_v5  ;;  %v734_v0 = vmul.f32 0.0078125, %v641_v3  ;;  %v767_v13 = vmul.f32 %v703_v52, %v703_v52 }
 0x19b   : > { %v643_v14 = vpop.xlane.xlu1 %642 }
 0x19c   : > { %v798_v19 = vsub.f32 %v734_v0, %v766_v54  ;;  %v735_v21 = vmul.f32 0.0078125, %v643_v14  ;;  %v2868_v0 = vld [vmem:[%s3597_s2 + $0x2] ss:$0 sm:$0xff] }
 0x19d   : > { %v549_v24 = vpop.xlane.xlu0 %548 }
 0x19e   : > { %v862_v26 = vadd.f32 1e-05, %v798_v19  ;;  %v799_v28 = vsub.f32 %v735_v21, %v767_v13  ;;  %v2847_v31 = vmul.f32 0.0078125, %v549_v24  ;;  %v830_v21 = vsub.f32 %v2579_v8, %v702_v62 }
 0x19f   : > { %v551_v35 = vpop.xlane.xlu1 %550 }
 0x1a0   : > { %v2262_v33 = vpop.eup %2261  ;;  %2265 = vrsqrt.f32 %v862_v26  ;;  %v863_v40 = vadd.f32 1e-05, %v799_v28  ;;  %v768_v43 = vmul.f32 %v2847_v31, %v2847_v31  ;;  %v2852_v45 = vmul.f32 0.0078125, %v551_v35 }
 0x1a1   : > { %v645_v46 = vpop.xlane.xlu0 %644  ;;  %v925_v44 = vmul.f32 %v2262_v33, %v829_v38 }
 0x1a2   : > { %2267 = vrsqrt.f32 %v863_v40  ;;  %v736_v47 = vmul.f32 0.0078125, %v645_v46  ;;  %v769_v42 = vmul.f32 %v2852_v45, %v2852_v45  ;;  %v831_v40 = vsub.f32 %v2584_v11, %v703_v52 }
 0x1a3   : > { %v647_v53 = vpop.xlane.xlu1 %646  ;;  %v961_v2 = vmul.f32 %v2858_v58, %v925_v44 }
 0x1a4   : > { %v2264_v61 = vpop.eup %2263  ;;  %v800_v41 = vsub.f32 %v736_v47, %v768_v43  ;;  %v737_v59 = vmul.f32 0.0078125, %v647_v53 }
 0x1a5   : > { %v553_v60 = vpop.xlane.xlu0 %552  ;;  %v924_v1 = vmul.f32 %v2264_v61, %v828_v51  ;;  %v997_v38 = vadd.f32 %v2868_v0, %v961_v2 }
 0x1a6   : > { %v864_v5 = vadd.f32 1e-05, %v800_v41  ;;  %v801_v54 = vsub.f32 %v737_v59, %v769_v42  ;;  %v2862_v3 = vmul.f32 0.0078125, %v553_v60 }
 0x1a7   : > { %v555_v49 = vpop.xlane.xlu1 %554  ;;  %v960_v14 = vmul.f32 %v2858_v58, %v924_v1 }
 0x1a8   : > { %2269 = vrsqrt.f32 %v864_v5  ;;  %v865_v13 = vadd.f32 1e-05, %v801_v54  ;;  %v770_v19 = vmul.f32 %v2862_v3, %v2862_v3  ;;  %v2874_v24 = vmul.f32 0.0078125, %v555_v49 }
 0x1a9   : > { %v649_v26 = vpop.xlane.xlu0 %648  ;;  %v996_v28 = vadd.f32 %v2868_v0, %v960_v14  ;;  %v832_v54 = vsub.f32 %v2592_v18, %v2847_v31 }
 0x1aa   : > { %v2266_v35 = vpop.eup %2265  ;;  %2271 = vrsqrt.f32 %v865_v13  ;;  %v738_v33 = vmul.f32 0.0078125, %v649_v26  ;;  %v771_v44 = vmul.f32 %v2874_v24, %v2874_v24 }
 0x1ab   : > { %2141 = vmatprep.mubr.f32.mxu1 %v996_v28  ;;  %v651_v43 = vpop.xlane.xlu1 %650  ;;  %v926_v46 = vmul.f32 %v2266_v35, %v830_v21  ;;  %v833_v21 = vsub.f32 %v2602_v23, %v2852_v45 }
 0x1ac   : > { %v2268_v47 = vpop.eup %2267  ;;  %v802_v8 = vsub.f32 %v738_v33, %v770_v19  ;;  %v739_v62 = vmul.f32 0.0078125, %v651_v43  ;;  %2142 = vmatmul.mubr.f32.vlgmr.msra.gmra.mrb[0].mxu1 %v997_v38 }
 0x1ad   : > { %v557_v51 = vpop.xlane.xlu0 %556  ;;  %v962_v53 = vmul.f32 %v2858_v58, %v926_v46  ;;  %v927_v61 = vmul.f32 %v2268_v47, %v831_v40 }
 0x1ae   : > { %v866_v42 = vadd.f32 1e-05, %v802_v8  ;;  %v803_v41 = vsub.f32 %v739_v62, %v771_v44  ;;  %v2882_v59 = vmul.f32 0.0078125, %v557_v51 }
 0x1af   : > { %v559_v60 = vpop.xlane.xlu1 %558  ;;  %v998_v11 = vadd.f32 %v2868_v0, %v962_v53  ;;  %v963_v52 = vmul.f32 %v2858_v58, %v927_v61  ;;  %v834_v53 = vsub.f32 %v2618_v34, %v2862_v3 }
 0x1b0   : > { %2273 = vrsqrt.f32 %v866_v42  ;;  %v867_v1 = vadd.f32 1e-05, %v803_v41  ;;  %v772_v5 = vmul.f32 %v2882_v59, %v2882_v59  ;;  %v2890_v2 = vmul.f32 0.0078125, %v559_v60 }
 0x1b1   : > { %v653_v49 = vpop.xlane.xlu0 %652  ;;  %2144 = vmatprep.mubr.f32.mxu1 %v998_v11  ;;  %v999_v14 = vadd.f32 %v2868_v0, %v963_v52  ;;  %v835_v52 = vsub.f32 %v2630_v39, %v2874_v24 }
 0x1b2   : > { %v2270_v13 = vpop.eup %2269  ;;  %2275 = vrsqrt.f32 %v867_v1  ;;  %v740_v19 = vmul.f32 0.0078125, %v653_v49  ;;  %v773_v33 = vmul.f32 %v2890_v2, %v2890_v2 }
 0x1b3   : > { %2145 = vmatmul.mubr.f32.gmra.mrb[2].mxu1 %v999_v14  ;;  %v655_v26 = vpop.xlane.xlu1 %654  ;;  %v928_v28 = vmul.f32 %v2270_v13, %v832_v54 }
 0x1b4   : > { %v2272_v35 = vpop.eup %2271  ;;  %v804_v18 = vsub.f32 %v740_v19, %v772_v5  ;;  %v741_v31 = vmul.f32 0.0078125, %v655_v26 }
 0x1b5   : > { %v561_v38 = vpop.xlane.xlu0 %560  ;;  %v964_v40 = vmul.f32 %v2858_v58, %v928_v28  ;;  %v929_v43 = vmul.f32 %v2272_v35, %v833_v21 }
 0x1b6   : > { %v868_v46 = vadd.f32 1e-05, %v804_v18  ;;  %v805_v47 = vsub.f32 %v741_v31, %v773_v33  ;;  %v2898_v44 = vmul.f32 0.0078125, %v561_v38  ;;  %v836_v31 = vsub.f32 %v2648_v50, %v2882_v59 }
 0x1b7   : > { %v563_v8 = vpop.xlane.xlu1 %562  ;;  %v1000_v23 = vadd.f32 %v2868_v0, %v964_v40  ;;  %v965_v45 = vmul.f32 %v2858_v58, %v929_v43 }
 0x1b8   : > { %2277 = vrsqrt.f32 %v868_v46  ;;  %v869_v62 = vadd.f32 1e-05, %v805_v47  ;;  %v774_v51 = vmul.f32 %v2898_v44, %v2898_v44  ;;  %v2906_v61 = vmul.f32 0.0078125, %v563_v8 }
 0x1b9   : > { %v657_v42 = vpop.xlane.xlu0 %656  ;;  %2147 = vmatprep.mubr.f32.mxu1 %v1000_v23  ;;  %v1001_v41 = vadd.f32 %v2868_v0, %v965_v45  ;;  %v837_v8 = vsub.f32 %v2658_v55, %v2890_v2 }
 0x1ba   : > { %v2274_v60 = vpop.eup %2273  ;;  %2279 = vrsqrt.f32 %v869_v62  ;;  %v742_v11 = vmul.f32 0.0078125, %v657_v42  ;;  %v775_v49 = vmul.f32 %v2906_v61, %v2906_v61 }
 0x1bb   : > { %2148 = vmatmul.mubr.f32.gmra.mrb[4].mxu1 %v1001_v41  ;;  %v659_v1 = vpop.xlane.xlu1 %658  ;;  %v930_v5 = vmul.f32 %v2274_v60, %v834_v53 }
 0x1bc   : > { %v2276_v54 = vpop.eup %2275  ;;  %v806_v34 = vsub.f32 %v742_v11, %v774_v51  ;;  %v743_v3 = vmul.f32 0.0078125, %v659_v1 }
 0x1bd   : > { %v565_v14 = vpop.xlane.xlu0 %564  ;;  %v966_v13 = vmul.f32 %v2858_v58, %v930_v5  ;;  %v931_v19 = vmul.f32 %v2276_v54, %v835_v52 }
 0x1be   : > { %v870_v21 = vadd.f32 1e-05, %v806_v34  ;;  %v807_v26 = vsub.f32 %v743_v3, %v775_v49  ;;  %v2914_v28 = vmul.f32 0.0078125, %v565_v14  ;;  %v838_v49 = vsub.f32 %v2684_v10, %v2898_v44 }
 0x1bf   : > { %v567_v35 = vpop.xlane.xlu1 %566  ;;  %v1002_v39 = vadd.f32 %v2868_v0, %v966_v13  ;;  %v967_v24 = vmul.f32 %v2858_v58, %v931_v19 }
 0x1c0   : > { %2281 = vrsqrt.f32 %v870_v21  ;;  %v871_v33 = vadd.f32 1e-05, %v807_v26  ;;  %v776_v18 = vmul.f32 %v2914_v28, %v2914_v28  ;;  %v2922_v38 = vmul.f32 0.0078125, %v567_v35 }
 0x1c1   : > { %v661_v40 = vpop.xlane.xlu0 %660  ;;  %2150 = vmatprep.mubr.f32.mxu1 %v1002_v39  ;;  %v1003_v43 = vadd.f32 %v2868_v0, %v967_v24  ;;  %v839_v21 = vsub.f32 %v2694_v16, %v2906_v61 }
 0x1c2   : > { %v2278_v46 = vpop.eup %2277  ;;  %2283 = vrsqrt.f32 %v871_v33  ;;  %v744_v47 = vmul.f32 0.0078125, %v661_v40  ;;  %v777_v51 = vmul.f32 %v2922_v38, %v2922_v38 }
 0x1c3   : > { %2151 = vmatmul.mubr.f32.gmra.mrb[6].mxu1 %v1003_v43  ;;  %v663_v23 = vpop.xlane.xlu1 %662  ;;  %v932_v45 = vmul.f32 %v2278_v46, %v836_v31 }
 0x1c4   : > { %v2280_v62 = vpop.eup %2279  ;;  %v808_v50 = vsub.f32 %v744_v47, %v776_v18  ;;  %v745_v59 = vmul.f32 0.0078125, %v663_v23 }
 0x1c5   : > { %v569_v53 = vpop.xlane.xlu0 %568  ;;  %v968_v42 = vmul.f32 %v2858_v58, %v932_v45  ;;  %v933_v41 = vmul.f32 %v2280_v62, %v837_v8  ;;  %v840_v45 = vsub.f32 %v2714_v30, %v2914_v28 }
 0x1c6   : > { %v872_v60 = vadd.f32 1e-05, %v808_v50  ;;  %v809_v11 = vsub.f32 %v745_v59, %v777_v51  ;;  %v2930_v52 = vmul.f32 0.0078125, %v569_v53 }
 0x1c7   : > { %v571_v1 = vpop.xlane.xlu1 %570  ;;  %v1004_v55 = vadd.f32 %v2868_v0, %v968_v42  ;;  %v969_v2 = vmul.f32 %v2858_v58, %v933_v41  ;;  %v841_v42 = vsub.f32 %v2722_v37, %v2922_v38 }
 0x1c8   : > { %2285 = vrsqrt.f32 %v872_v60  ;;  %v873_v5 = vadd.f32 1e-05, %v809_v11  ;;  %v778_v54 = vmul.f32 %v2930_v52, %v2930_v52  ;;  %v2938_v34 = vmul.f32 0.0078125, %v571_v1 }
 0x1c9   : > { %v665_v3 = vpop.xlane.xlu0 %664  ;;  %2153 = vmatprep.mubr.f32.mxu1 %v1004_v55  ;;  %v1005_v14 = vadd.f32 %v2868_v0, %v969_v2 }
 0x1ca   : > { %v2282_v13 = vpop.eup %2281  ;;  %2287 = vrsqrt.f32 %v873_v5  ;;  %v746_v19 = vmul.f32 0.0078125, %v665_v3  ;;  %v779_v24 = vmul.f32 %v2938_v34, %v2938_v34 }
 0x1cb   : > { %2154 = vmatmul.mubr.f32.gmra.mrb[8].mxu1 %v1005_v14  ;;  %v667_v26 = vpop.xlane.xlu1 %666  ;;  %v934_v35 = vmul.f32 %v2282_v13, %v838_v49 }
 0x1cc   : > { %v2284_v39 = vpop.eup %2283  ;;  %v810_v10 = vsub.f32 %v746_v19, %v778_v54  ;;  %v747_v44 = vmul.f32 0.0078125, %v667_v26 }
 0x1cd   : > { %v573_v33 = vpop.xlane.xlu0 %572  ;;  %v970_v18 = vmul.f32 %v2858_v58, %v934_v35  ;;  %v935_v31 = vmul.f32 %v2284_v39, %v839_v21  ;;  %v842_v21 = vsub.f32 %v2736_v48, %v2930_v52 }
 0x1ce   : > { %v874_v40 = vadd.f32 1e-05, %v810_v10  ;;  %v811_v43 = vsub.f32 %v747_v44, %v779_v24  ;;  %v2946_v46 = vmul.f32 0.0078125, %v573_v33  ;;  %v843_v44 = vsub.f32 %v2744_v57, %v2938_v34 }
 0x1cf   : > { %v575_v47 = vpop.xlane.xlu1 %574  ;;  %v1006_v16 = vadd.f32 %v2868_v0, %v970_v18  ;;  %v971_v61 = vmul.f32 %v2858_v58, %v935_v31 }
 0x1d0   : > { %2289 = vrsqrt.f32 %v874_v40  ;;  %v875_v8 = vadd.f32 1e-05, %v811_v43  ;;  %v780_v23 = vmul.f32 %v2946_v46, %v2946_v46  ;;  %v2954_v62 = vmul.f32 0.0078125, %v575_v47 }
 0x1d1   : > { %v669_v51 = vpop.xlane.xlu0 %668  ;;  %2156 = vmatprep.mubr.f32.mxu1 %v1006_v16  ;;  %v1007_v50 = vadd.f32 %v2868_v0, %v971_v61 }
 0x1d2   : > { %v2286_v59 = vpop.eup %2285  ;;  %2291 = vrsqrt.f32 %v875_v8  ;;  %v748_v53 = vmul.f32 0.0078125, %v669_v51  ;;  %v781_v1 = vmul.f32 %v2954_v62, %v2954_v62 }
 0x1d3   : > { %2157 = vmatmul.mubr.f32.gmra.mrb[10].mxu1 %v1007_v50  ;;  %v671_v41 = vpop.xlane.xlu1 %670  ;;  %v936_v60 = vmul.f32 %v2286_v59, %v840_v45  ;;  %v844_v59 = vsub.f32 %v2755_v63, %v2946_v46 }
 0x1d4   : > { %v2288_v11 = vpop.eup %2287  ;;  %v812_v30 = vsub.f32 %v748_v53, %v780_v23  ;;  %v749_v28 = vmul.f32 0.0078125, %v671_v41 }
 0x1d5   : > { %v577_v55 = vpop.xlane.xlu0 %576  ;;  %v972_v2 = vmul.f32 %v2858_v58, %v936_v60  ;;  %v937_v5 = vmul.f32 %v2288_v11, %v841_v42 }
 0x1d6   : > { %v876_v54 = vadd.f32 1e-05, %v812_v30  ;;  %v813_v49 = vsub.f32 %v749_v28, %v781_v1  ;;  %v2962_v3 = vmul.f32 0.0078125, %v577_v55  ;;  %v845_v1 = vsub.f32 %v2760_v4, %v2954_v62 }
 0x1d7   : > { %v579_v14 = vpop.xlane.xlu1 %578  ;;  %v1008_v37 = vadd.f32 %v2868_v0, %v972_v2  ;;  %v973_v38 = vmul.f32 %v2858_v58, %v937_v5 }
 0x1d8   : > { %2293 = vrsqrt.f32 %v876_v54  ;;  %v877_v13 = vadd.f32 1e-05, %v813_v49  ;;  %v782_v19 = vmul.f32 %v2962_v3, %v2962_v3  ;;  %v2970_v26 = vmul.f32 0.0078125, %v579_v14 }
 0x1d9   : > { %v673_v35 = vpop.xlane.xlu0 %672  ;;  %2159 = vmatprep.mubr.f32.mxu1 %v1008_v37  ;;  %v1009_v39 = vadd.f32 %v2868_v0, %v973_v38 }
 0x1da   : > { %v2290_v24 = vpop.eup %2289  ;;  %2295 = vrsqrt.f32 %v877_v13  ;;  %v750_v10 = vmul.f32 0.0078125, %v673_v35  ;;  %v783_v40 = vmul.f32 %v2970_v26, %v2970_v26  ;;  %v846_v35 = vsub.f32 %v2767_v56, %v2962_v3 }
 0x1db   : > { %2160 = vmatmul.mubr.f32.gmra.mrb[12].mxu1 %v1009_v39  ;;  %v675_v33 = vpop.xlane.xlu1 %674  ;;  %v938_v18 = vmul.f32 %v2290_v24, %v842_v21 }
 0x1dc   : > { %v2292_v31 = vpop.eup %2291  ;;  %v814_v48 = vsub.f32 %v750_v10, %v782_v19  ;;  %v751_v52 = vmul.f32 0.0078125, %v675_v33 }
 0x1dd   : > { %v581_v43 = vpop.xlane.xlu0 %580  ;;  %v974_v47 = vmul.f32 %v2858_v58, %v938_v18  ;;  %v939_v16 = vmul.f32 %v2292_v31, %v843_v44  ;;  %v847_v18 = vsub.f32 %v2772_v6, %v2970_v26 }
 0x1de   : > { %v878_v61 = vadd.f32 1e-05, %v814_v48  ;;  %v815_v8 = vsub.f32 %v751_v52, %v783_v40  ;;  %v2978_v23 = vmul.f32 0.0078125, %v581_v43 }
 0x1df   : > { %v583_v45 = vpop.xlane.xlu1 %582  ;;  %v1010_v57 = vadd.f32 %v2868_v0, %v974_v47  ;;  %v975_v34 = vmul.f32 %v2858_v58, %v939_v16 }
 0x1e0   : > { %2297 = vrsqrt.f32 %v878_v61  ;;  %v879_v51 = vadd.f32 1e-05, %v815_v8  ;;  %v784_v50 = vmul.f32 %v2978_v23, %v2978_v23  ;;  %v2986_v53 = vmul.f32 0.0078125, %v583_v45 }
 0x1e1   : > { %v677_v42 = vpop.xlane.xlu0 %676  ;;  %2162 = vmatprep.mubr.f32.mxu1 %v1010_v57  ;;  %v1011_v41 = vadd.f32 %v2868_v0, %v975_v34 }
 0x1e2   : > { %v2294_v60 = vpop.eup %2293  ;;  %2299 = vrsqrt.f32 %v879_v51  ;;  %v752_v11 = vmul.f32 0.0078125, %v677_v42  ;;  %v785_v2 = vmul.f32 %v2986_v53, %v2986_v53 }
 0x1e3   : > { %2163 = vmatmul.mubr.f32.gmra.mrb[14].mxu1 %v1011_v41  ;;  %v679_v30 = vpop.xlane.xlu1 %678  ;;  %v940_v28 = vmul.f32 %v2294_v60, %v844_v59 }
 0x1e4   : > { %v2296_v55 = vpop.eup %2295  ;;  %v816_v63 = vsub.f32 %v752_v11, %v784_v50  ;;  %v753_v46 = vmul.f32 0.0078125, %v679_v30  ;;  %v848_v50 = vsub.f32 %v2779_v7, %v2978_v23 }
 0x1e5   : > { %v585_v5 = vpop.xlane.xlu0 %584  ;;  %v976_v54 = vmul.f32 %v2858_v58, %v940_v28  ;;  %v941_v49 = vmul.f32 %v2296_v55, %v845_v1  ;;  %v849_v1 = vsub.f32 %v2784_v9, %v2986_v53 }
 0x1e6   : > { %v880_v14 = vadd.f32 1e-05, %v816_v63  ;;  %v817_v37 = vsub.f32 %v753_v46, %v785_v2  ;;  %v2994_v38 = vmul.f32 0.0078125, %v585_v5 }
 0x1e7   : > { %v587_v13 = vpop.xlane.xlu1 %586  ;;  %v1012_v4 = vadd.f32 %v2868_v0, %v976_v54  ;;  %v977_v62 = vmul.f32 %v2858_v58, %v941_v49 }
 0x1e8   : > { %2301 = vrsqrt.f32 %v880_v14  ;;  %v881_v19 = vadd.f32 1e-05, %v817_v37  ;;  %v786_v21 = vmul.f32 %v2994_v38, %v2994_v38  ;;  %v3002_v39 = vmul.f32 0.0078125, %v587_v13 }
 0x1e9   : > { %v681_v24 = vpop.xlane.xlu0 %680  ;;  %2165 = vmatprep.mubr.f32.mxu1 %v1012_v4  ;;  %v1013_v10 = vadd.f32 %v2868_v0, %v977_v62  ;;  %v850_v62 = vsub.f32 %v2790_v12, %v2994_v38 }
 0x1ea   : > { %v2298_v44 = vpop.eup %2297  ;;  %2303 = vrsqrt.f32 %v881_v19  ;;  %v754_v33 = vmul.f32 0.0078125, %v681_v24  ;;  %v787_v52 = vmul.f32 %v3002_v39, %v3002_v39 }
 0x1eb   : > { %2166 = vmatmul.mubr.f32.gmra.mrb[16].mxu1 %v1013_v10  ;;  %v683_v31 = vpop.xlane.xlu1 %682  ;;  %v942_v40 = vmul.f32 %v2298_v44, %v846_v35  ;;  %v851_v44 = vsub.f32 %v2795_v15, %v3002_v39 }
 0x1ec   : > { %v2300_v48 = vpop.eup %2299  ;;  %v818_v56 = vsub.f32 %v754_v33, %v786_v21  ;;  %v755_v3 = vmul.f32 0.0078125, %v683_v31 }
 0x1ed   : > { %v589_v43 = vpop.xlane.xlu0 %588  ;;  %v978_v47 = vmul.f32 %v2858_v58, %v942_v40  ;;  %v943_v16 = vmul.f32 %v2300_v48, %v847_v18 }
 0x1ee   : > { %v882_v61 = vadd.f32 1e-05, %v818_v56  ;;  %v819_v8 = vsub.f32 %v755_v3, %v787_v52  ;;  %v3010_v45 = vmul.f32 0.0078125, %v589_v43 }
 0x1ef   : > { %v591_v57 = vpop.xlane.xlu1 %590  ;;  %v1014_v6 = vadd.f32 %v2868_v0, %v978_v47  ;;  %v979_v26 = vmul.f32 %v2858_v58, %v943_v16 }
 0x1f0   : > { %2305 = vrsqrt.f32 %v882_v61  ;;  %v883_v34 = vadd.f32 1e-05, %v819_v8  ;;  %v788_v51 = vmul.f32 %v3010_v45, %v3010_v45  ;;  %v3018_v59 = vmul.f32 0.0078125, %v591_v57 }
 0x1f1   : > { %v685_v42 = vpop.xlane.xlu0 %684  ;;  %2168 = vmatprep.mubr.f32.mxu1 %v1014_v6  ;;  %v1015_v41 = vadd.f32 %v2868_v0, %v979_v26  ;;  %v852_v57 = vsub.f32 %v2801_v17, %v3010_v45 }
 0x1f2   : > { %v2302_v60 = vpop.eup %2301  ;;  %2307 = vrsqrt.f32 %v883_v34  ;;  %v756_v11 = vmul.f32 0.0078125, %v685_v42  ;;  %v789_v2 = vmul.f32 %v3018_v59, %v3018_v59  ;;  %v853_v42 = vsub.f32 %v2806_v20, %v3018_v59 }
 0x1f3   : > { %2169 = vmatmul.mubr.f32.gmra.mrb[18].mxu1 %v1015_v41  ;;  %v687_v30 = vpop.xlane.xlu1 %686  ;;  %v944_v28 = vmul.f32 %v2302_v60, %v848_v50 }
 0x1f4   : > { %v2304_v55 = vpop.eup %2303  ;;  %v820_v7 = vsub.f32 %v756_v11, %v788_v51  ;;  %v757_v23 = vmul.f32 0.0078125, %v687_v30 }
 0x1f5   : > { %v593_v63 = vpop.xlane.xlu0 %592  ;;  %v980_v46 = vmul.f32 %v2858_v58, %v944_v28  ;;  %v945_v5 = vmul.f32 %v2304_v55, %v849_v1 }
 0x1f6   : > { %v884_v54 = vadd.f32 1e-05, %v820_v7  ;;  %v821_v49 = vsub.f32 %v757_v23, %v789_v2  ;;  %v3026_v14 = vmul.f32 0.0078125, %v593_v63 }
 0x1f7   : > { %v595_v37 = vpop.xlane.xlu1 %594  ;;  %v1016_v9 = vadd.f32 %v2868_v0, %v980_v46  ;;  %v981_v53 = vmul.f32 %v2858_v58, %v945_v5 }
 0x1f8   : > { %2309 = vrsqrt.f32 %v884_v54  ;;  %v885_v13 = vadd.f32 1e-05, %v821_v49  ;;  %v790_v4 = vmul.f32 %v3026_v14, %v3026_v14  ;;  %v3034_v19 = vmul.f32 0.0078125, %v595_v37 }
 0x1f9   : > { %v689_v21 = vpop.xlane.xlu0 %688  ;;  %2171 = vmatprep.mubr.f32.mxu1 %v1016_v9  ;;  %v1017_v35 = vadd.f32 %v2868_v0, %v981_v53  ;;  %v854_v54 = vsub.f32 %v2812_v22, %v3026_v14 }
 0x1fa   : > { %v2306_v24 = vpop.eup %2305  ;;  %2311 = vrsqrt.f32 %v885_v13  ;;  %v758_v10 = vmul.f32 0.0078125, %v689_v21  ;;  %v791_v40 = vmul.f32 %v3034_v19, %v3034_v19 }
 0x1fb   : > { %2172 = vmatmul.mubr.f32.gmra.mrb[20].mxu1 %v1017_v35  ;;  %v691_v33 = vpop.xlane.xlu1 %690  ;;  %v946_v18 = vmul.f32 %v2306_v24, %v850_v62 }
 0x1fc   : > { %v2308_v31 = vpop.eup %2307  ;;  %v822_v12 = vsub.f32 %v758_v10, %v790_v4  ;;  %v759_v38 = vmul.f32 0.0078125, %v691_v33  ;;  %v855_v4 = vsub.f32 %v2817_v25, %v3034_v19 }
 0x1fd   : > { %v597_v48 = vpop.xlane.xlu0 %596  ;;  %v982_v52 = vmul.f32 %v2858_v58, %v946_v18  ;;  %v947_v56 = vmul.f32 %v2308_v31, %v851_v44 }
 0x1fe   : > { %v886_v3 = vadd.f32 1e-05, %v822_v12  ;;  %v823_v43 = vsub.f32 %v759_v38, %v791_v40  ;;  %v3042_v47 = vmul.f32 0.0078125, %v597_v48 }
 0x1ff   : > { %v599_v16 = vpop.xlane.xlu1 %598  ;;  %v1018_v15 = vadd.f32 %v2868_v0, %v982_v52  ;;  %v983_v39 = vmul.f32 %v2858_v58, %v947_v56 }
 0x200   : > { %2313 = vrsqrt.f32 %v886_v3  ;;  %v887_v61 = vadd.f32 1e-05, %v823_v43  ;;  %v792_v8 = vmul.f32 %v3042_v47, %v3042_v47  ;;  %v729_v6 = vmul.f32 0.0078125, %v599_v16 }
 0x201   : > { %v693_v26 = vpop.xlane.xlu0 %692  ;;  %2174 = vmatprep.mubr.f32.mxu1 %v1018_v15  ;;  %v1019_v34 = vadd.f32 %v2868_v0, %v983_v39  ;;  %v856_v25 = vsub.f32 %v2823_v27, %v3042_v47 }
 0x202   : > { %v2310_v51 = vpop.eup %2309  ;;  %2315 = vrsqrt.f32 %v887_v61  ;;  %v760_v50 = vmul.f32 0.0078125, %v693_v26  ;;  %v793_v1 = vmul.f32 %v729_v6, %v729_v6  ;;  %v857_v48 = vsub.f32 %v2828_v29, %v729_v6 }
 0x203   : > { %2175 = vmatmul.mubr.f32.gmra.mrb[22].mxu1 %v1019_v34  ;;  %v695_v41 = vpop.xlane.xlu1 %694  ;;  %v948_v60 = vmul.f32 %v2310_v51, %v852_v57 }
 0x204   : > { %v2312_v11 = vpop.eup %2311  ;;  %v824_v30 = vsub.f32 %v760_v50, %v792_v8  ;;  %v761_v28 = vmul.f32 0.0078125, %v695_v41 }
 0x205   : > { %v601_v55 = vpop.xlane.xlu0 %600  ;;  %v984_v17 = vmul.f32 %v2858_v58, %v948_v60  ;;  %v949_v45 = vmul.f32 %v2312_v11, %v853_v42 }
 0x206   : > { %v888_v2 = vadd.f32 1e-05, %v824_v30  ;;  %v825_v7 = vsub.f32 %v761_v28, %v793_v1  ;;  %v730_v23 = vmul.f32 0.0078125, %v601_v55 }
 0x207   : > { %v603_v63 = vpop.xlane.xlu1 %602  ;;  %v1020_v46 = vadd.f32 %v2868_v0, %v984_v17  ;;  %v985_v5 = vmul.f32 %v2858_v58, %v949_v45 }
 0x208   : > { %2317 = vrsqrt.f32 %v888_v2  ;;  %v889_v20 = vadd.f32 1e-05, %v825_v7  ;;  %v794_v59 = vmul.f32 %v730_v23, %v730_v23  ;;  %v731_v49 = vmul.f32 0.0078125, %v603_v63 }
 0x209   : > { %v697_v37 = vpop.xlane.xlu0 %696  ;;  %2177 = vmatprep.mubr.f32.mxu1 %v1020_v46  ;;  %v1021_v9 = vadd.f32 %v2868_v0, %v985_v5  ;;  %v858_v39 = vsub.f32 %v2834_v32, %v730_v23  ;;  %v3081_v32 = vld [vmem:[%s3599_s4] ss:$0 sm:$0xff] }
 0x20a   : > { %v2314_v53 = vpop.eup %2313  ;;  %2319 = vrsqrt.f32 %v889_v20  ;;  %v762_v13 = vmul.f32 0.0078125, %v697_v37  ;;  %v795_v24 = vmul.f32 %v731_v49, %v731_v49  ;;  %v859_v61 = vsub.f32 %v2839_v36, %v731_v49 }
 0x20b   : > { %2178 = vmatmul.mubr.f32.gmra.mrb[24].mxu1 %v1021_v9  ;;  %v699_v62 = vpop.xlane.xlu1 %698  ;;  %v950_v21 = vmul.f32 %v2314_v53, %v854_v54 }
 0x20c   : > { %v2316_v35 = vpop.eup %2315  ;;  %v826_v10 = vsub.f32 %v762_v13, %v794_v59  ;;  %v763_v44 = vmul.f32 0.0078125, %v699_v62 }
 0x20d   : > { %v986_v22 = vmul.f32 %v2858_v58, %v950_v21  ;;  %v951_v14 = vmul.f32 %v2316_v35, %v855_v4 }
 0x20e   : > { %v890_v33 = vadd.f32 1e-05, %v826_v10  ;;  %v827_v18 = vsub.f32 %v763_v44, %v795_v24 }
 0x20f   : > { %v1022_v31 = vadd.f32 %v2868_v0, %v986_v22  ;;  %v987_v40 = vmul.f32 %v2858_v58, %v951_v14 }
 0x210   : > { %2321 = vrsqrt.f32 %v890_v33  ;;  %v891_v12 = vadd.f32 1e-05, %v827_v18 }
 0x211   : > { %2180 = vmatprep.mubr.f32.mxu1 %v1022_v31  ;;  %v1023_v19 = vadd.f32 %v2868_v0, %v987_v40 }
 0x212   : > { %v2318_v38 = vpop.eup %2317  ;;  %2323 = vrsqrt.f32 %v891_v12 }
 0x213   : > { %2181 = vmatmul.mubr.f32.gmra.mrb[26].mxu1 %v1023_v19  ;;  %v952_v52 = vmul.f32 %v2318_v38, %v856_v25 }
 0x214   : > { %v2320_v56 = vpop.eup %2319 }
 0x215   : > { %v988_v3 = vmul.f32 %v2858_v58, %v952_v52  ;;  %v953_v43 = vmul.f32 %v2320_v56, %v857_v48 }
 0x217   : > { %v1024_v16 = vadd.f32 %v2868_v0, %v988_v3  ;;  %v989_v15 = vmul.f32 %v2858_v58, %v953_v43 }
 0x219   : > { %2183 = vmatprep.mubr.f32.mxu1 %v1024_v16  ;;  %v1025_v27 = vadd.f32 %v2868_v0, %v989_v15 }
 0x21a   : > { %v2322_v47 = vpop.eup %2321 }
 0x21b   : > { %2184 = vmatmul.mubr.f32.gmra.mrb[28].mxu1 %v1025_v27  ;;  %v954_v29 = vmul.f32 %v2322_v47, %v858_v39 }
 0x21c   : > { %v2324_v8 = vpop.eup %2323 }
 0x21d   : > { %v990_v57 = vmul.f32 %v2858_v58, %v954_v29  ;;  %v955_v6 = vmul.f32 %v2324_v8, %v859_v61 }
 0x21f   : > { %v1026_v26 = vadd.f32 %v2868_v0, %v990_v57  ;;  %v991_v34 = vmul.f32 %v2858_v58, %v955_v6 }
 0x221   : > { %2186 = vmatprep.mubr.f32.mxu1 %v1026_v26  ;;  %v1027_v51 = vadd.f32 %v2868_v0, %v991_v34 }
 0x223   : > { %2187 = vmatmul.mubr.f32.gmra.mrb[30].mxu1 %v1027_v51 }
 0x27f   : > { %v2143_v36 = vpop.f32.mrb[0].mxu1 }
 0x280   : > { %v1121_v50 = vadd.f32 %v2143_v36, %v3081_v32  ;;  %v1115_v42 = vpop.f32.mrb[1].mxu1 }
 0x281   : > { %v1116_v41 = vadd.f32 %v3081_v32, %v1115_v42 }
 0x282   : > { %v3085_v60 = vmax.f32 %v1121_v50, 0.0 }
 0x283   : > { %v3087_v11 = vmax.f32 %v1116_v41, 0.0 }
 0x284   : > { %1310 = vadd.xlane.f32.xlu1 %v3085_v60  ;;  %v1373_v0 = vmul.f32 %v3085_v60, %v3085_v60 }
 0x285   : > { %1308 = vadd.xlane.f32.xlu0 %v3087_v11  ;;  %v1372_v28 = vmul.f32 %v3087_v11, %v3087_v11 }
 0x286   : > { %v2146_v58 = vpop.f32.mrb[2].mxu1 }
 0x287   : > { %v1131_v1 = vadd.f32 %v2146_v58, %v3081_v32  ;;  %v1125_v30 = vpop.f32.mrb[3].mxu1 }
 0x288   : > { %v1126_v55 = vadd.f32 %v3081_v32, %v1125_v30  ;;  %1406 = vadd.xlane.f32.xlu1 %v1373_v0 }
 0x289   : > { %v3097_v17 = vmax.f32 %v1131_v1, 0.0  ;;  %1404 = vadd.xlane.f32.xlu0 %v1372_v28 }
 0x28a   : > { %v3099_v45 = vmax.f32 %v1126_v55, 0.0 }
 0x28b   : > { %v1375_v7 = vmul.f32 %v3097_v17, %v3097_v17 }
 0x28c   : > { %1314 = vadd.xlane.f32.xlu1 %v3097_v17  ;;  %v1374_v46 = vmul.f32 %v3099_v45, %v3099_v45 }
 0x28d   : > { %1312 = vadd.xlane.f32.xlu0 %v3099_v45 }
 0x28e   : > { %v2149_v2 = vpop.f32.mrb[4].mxu1 }
 0x28f   : > { %v1141_v23 = vadd.f32 %v2149_v2, %v3081_v32  ;;  %v1135_v63 = vpop.f32.mrb[5].mxu1 }
 0x290   : > { %v1136_v5 = vadd.f32 %v3081_v32, %v1135_v63  ;;  %1410 = vadd.xlane.f32.xlu1 %v1375_v7 }
 0x291   : > { %v3109_v20 = vmax.f32 %v1141_v23, 0.0  ;;  %1408 = vadd.xlane.f32.xlu0 %v1374_v46 }
 0x292   : > { %v3111_v59 = vmax.f32 %v1136_v5, 0.0 }
 0x293   : > { %v1377_v49 = vmul.f32 %v3109_v20, %v3109_v20 }
 0x294   : > { %1318 = vadd.xlane.f32.xlu1 %v3109_v20  ;;  %v1376_v53 = vmul.f32 %v3111_v59, %v3111_v59 }
 0x295   : > { %1316 = vadd.xlane.f32.xlu0 %v3111_v59 }
 0x296   : > { %v2152_v54 = vpop.f32.mrb[6].mxu1 }
 0x297   : > { %v1151_v37 = vadd.f32 %v2152_v54, %v3081_v32  ;;  %v1145_v9 = vpop.f32.mrb[7].mxu1 }
 0x298   : > { %v1146_v13 = vadd.f32 %v3081_v32, %v1145_v9  ;;  %1414 = vadd.xlane.f32.xlu1 %v1377_v49 }
 0x299   : > { %v3121_v4 = vmax.f32 %v1151_v37, 0.0  ;;  %1412 = vadd.xlane.f32.xlu0 %v1376_v53 }
 0x29a   : > { %v3123_v62 = vmax.f32 %v1146_v13, 0.0 }
 0x29b   : > { %v1379_v35 = vmul.f32 %v3121_v4, %v3121_v4 }
 0x29c   : > { %1322 = vadd.xlane.f32.xlu1 %v3121_v4  ;;  %v1378_v44 = vmul.f32 %v3123_v62, %v3123_v62 }
 0x29d   : > { %1320 = vadd.xlane.f32.xlu0 %v3123_v62 }
 0x29e   : > { %v2155_v21 = vpop.f32.mrb[8].mxu1 }
 0x29f   : > { %v1161_v24 = vadd.f32 %v2155_v21, %v3081_v32  ;;  %v1155_v10 = vpop.f32.mrb[9].mxu1 }
 0x2a0   : > { %v1156_v22 = vadd.f32 %v3081_v32, %v1155_v10  ;;  %1418 = vadd.xlane.f32.xlu1 %v1379_v35 }
 0x2a1   : > { %v3133_v14 = vmax.f32 %v1161_v24, 0.0  ;;  %1416 = vadd.xlane.f32.xlu0 %v1378_v44 }
 0x2a2   : > { %v3135_v33 = vmax.f32 %v1156_v22, 0.0 }
 0x2a3   : > { %v1381_v31 = vmul.f32 %v3133_v14, %v3133_v14 }
 0x2a4   : > { %1326 = vadd.xlane.f32.xlu1 %v3133_v14  ;;  %v1380_v25 = vmul.f32 %v3135_v33, %v3135_v33 }
 0x2a5   : > { %1324 = vadd.xlane.f32.xlu0 %v3135_v33 }
 0x2a6   : > { %v2158_v18 = vpop.f32.mrb[10].mxu1 }
 0x2a7   : > { %v1171_v40 = vadd.f32 %v2158_v18, %v3081_v32  ;;  %v1165_v12 = vpop.f32.mrb[11].mxu1 }
 0x2a8   : > { %v1166_v19 = vadd.f32 %v3081_v32, %v1165_v12  ;;  %1422 = vadd.xlane.f32.xlu1 %v1381_v31 }
 0x2a9   : > { %v3145_v38 = vmax.f32 %v1171_v40, 0.0  ;;  %1420 = vadd.xlane.f32.xlu0 %v1380_v25 }
 0x2aa   : > { %v3147_v48 = vmax.f32 %v1166_v19, 0.0 }
 0x2ab   : > { %v1383_v56 = vmul.f32 %v3145_v38, %v3145_v38 }
 0x2ac   : > { %1330 = vadd.xlane.f32.xlu1 %v3145_v38  ;;  %v1382_v16 = vmul.f32 %v3147_v48, %v3147_v48 }
 0x2ad   : > { %1328 = vadd.xlane.f32.xlu0 %v3147_v48 }
 0x2ae   : > { %v2161_v52 = vpop.f32.mrb[12].mxu1 }
 0x2af   : > { %v1181_v3 = vadd.f32 %v2161_v52, %v3081_v32  ;;  %v1175_v43 = vpop.f32.mrb[13].mxu1 }
 0x2b0   : > { %v1176_v15 = vadd.f32 %v3081_v32, %v1175_v43  ;;  %1426 = vadd.xlane.f32.xlu1 %v1383_v56 }
 0x2b1   : > { %v3157_v39 = vmax.f32 %v1181_v3, 0.0  ;;  %1424 = vadd.xlane.f32.xlu0 %v1382_v16 }
 0x2b2   : > { %v3159_v27 = vmax.f32 %v1176_v15, 0.0 }
 0x2b3   : > { %v1385_v61 = vmul.f32 %v3157_v39, %v3157_v39 }
 0x2b4   : > { %1334 = vadd.xlane.f32.xlu1 %v3157_v39  ;;  %v1384_v57 = vmul.f32 %v3159_v27, %v3159_v27 }
 0x2b5   : > { %1332 = vadd.xlane.f32.xlu0 %v3159_v27 }
 0x2b6   : > { %v2164_v47 = vpop.f32.mrb[14].mxu1 }
 0x2b7   : > { %v1191_v29 = vadd.f32 %v2164_v47, %v3081_v32  ;;  %v1185_v8 = vpop.f32.mrb[15].mxu1 }
 0x2b8   : > { %v1186_v6 = vadd.f32 %v3081_v32, %v1185_v8  ;;  %1430 = vadd.xlane.f32.xlu1 %v1385_v61 }
 0x2b9   : > { %v3169_v26 = vmax.f32 %v1191_v29, 0.0  ;;  %1428 = vadd.xlane.f32.xlu0 %v1384_v57 }
 0x2ba   : > { %v3171_v34 = vmax.f32 %v1186_v6, 0.0 }
 0x2bb   : > { %v1387_v36 = vmul.f32 %v3169_v26, %v3169_v26 }
 0x2bc   : > { %1338 = vadd.xlane.f32.xlu1 %v3169_v26  ;;  %v1386_v41 = vmul.f32 %v3171_v34, %v3171_v34 }
 0x2bd   : > { %1336 = vadd.xlane.f32.xlu0 %v3171_v34 }
 0x2be   : > { %v2167_v51 = vpop.f32.mrb[16].mxu1 }
 0x2bf   : > { %v1201_v50 = vadd.f32 %v2167_v51, %v3081_v32  ;;  %v1195_v42 = vpop.f32.mrb[17].mxu1 }
 0x2c0   : > { %v1196_v58 = vadd.f32 %v3081_v32, %v1195_v42  ;;  %1434 = vadd.xlane.f32.xlu1 %v1387_v36 }
 0x2c1   : > { %v3181_v0 = vmax.f32 %v1201_v50, 0.0  ;;  %1432 = vadd.xlane.f32.xlu0 %v1386_v41 }
 0x2c2   : > { %v3183_v1 = vmax.f32 %v1196_v58, 0.0 }
 0x2c3   : > { %v1389_v28 = vmul.f32 %v3181_v0, %v3181_v0 }
 0x2c4   : > { %1342 = vadd.xlane.f32.xlu1 %v3181_v0  ;;  %v1388_v7 = vmul.f32 %v3183_v1, %v3183_v1 }
 0x2c5   : > { %1340 = vadd.xlane.f32.xlu0 %v3183_v1 }
 0x2c6   : > { %v2170_v30 = vpop.f32.mrb[18].mxu1 }
 0x2c7   : > { %v1211_v55 = vadd.f32 %v2170_v30, %v3081_v32  ;;  %v1205_v2 = vpop.f32.mrb[19].mxu1 }
 0x2c8   : > { %v1206_v23 = vadd.f32 %v3081_v32, %v1205_v2  ;;  %1438 = vadd.xlane.f32.xlu1 %v1389_v28 }
 0x2c9   : > { %v3193_v63 = vmax.f32 %v1211_v55, 0.0  ;;  %1436 = vadd.xlane.f32.xlu0 %v1388_v7 }
 0x2ca   : > { %v3195_v46 = vmax.f32 %v1206_v23, 0.0 }
 0x2cb   : > { %v1391_v54 = vmul.f32 %v3193_v63, %v3193_v63 }
 0x2cc   : > { %1346 = vadd.xlane.f32.xlu1 %v3193_v63  ;;  %v1390_v9 = vmul.f32 %v3195_v46, %v3195_v46 }
 0x2cd   : > { %1344 = vadd.xlane.f32.xlu0 %v3195_v46 }
 0x2ce   : > { %v2173_v5 = vpop.f32.mrb[20].mxu1 }
 0x2cf   : > { %v1221_v49 = vadd.f32 %v2173_v5, %v3081_v32  ;;  %v1215_v37 = vpop.f32.mrb[21].mxu1 }
 0x2d0   : > { %v1216_v53 = vadd.f32 %v3081_v32, %v1215_v37  ;;  %1442 = vadd.xlane.f32.xlu1 %v1391_v54 }
 0x2d1   : > { %v3205_v13 = vmax.f32 %v1221_v49, 0.0  ;;  %1440 = vadd.xlane.f32.xlu0 %v1390_v9 }
 0x2d2   : > { %v3207_v21 = vmax.f32 %v1216_v53, 0.0 }
 0x2d3   : > { %v1393_v24 = vmul.f32 %v3205_v13, %v3205_v13 }
 0x2d4   : > { %1350 = vadd.xlane.f32.xlu1 %v3205_v13  ;;  %v1392_v22 = vmul.f32 %v3207_v21, %v3207_v21 }
 0x2d5   : > { %1348 = vadd.xlane.f32.xlu0 %v3207_v21 }
 0x2d6   : > { %v2176_v35 = vpop.f32.mrb[22].mxu1 }
 0x2d7   : > { %v1231_v10 = vadd.f32 %v2176_v35, %v3081_v32  ;;  %v1225_v44 = vpop.f32.mrb[23].mxu1 }
 0x2d8   : > { %v1226_v18 = vadd.f32 %v3081_v32, %v1225_v44  ;;  %1446 = vadd.xlane.f32.xlu1 %v1393_v24 }
 0x2d9   : > { %v3217_v31 = vmax.f32 %v1231_v10, 0.0  ;;  %1444 = vadd.xlane.f32.xlu0 %v1392_v22 }
 0x2da   : > { %v3219_v40 = vmax.f32 %v1226_v18, 0.0 }
 0x2db   : > { %v1395_v25 = vmul.f32 %v3217_v31, %v3217_v31 }
 0x2dc   : > { %1354 = vadd.xlane.f32.xlu1 %v3217_v31  ;;  %v1394_v56 = vmul.f32 %v3219_v40, %v3219_v40 }
 0x2dd   : > { %1352 = vadd.xlane.f32.xlu0 %v3219_v40 }
 0x2de   : > { %v2179_v12 = vpop.f32.mrb[24].mxu1 }
 0x2df   : > { %v1241_v19 = vadd.f32 %v2179_v12, %v3081_v32  ;;  %v1235_v52 = vpop.f32.mrb[25].mxu1 }
 0x2e0   : > { %v1236_v3 = vadd.f32 %v3081_v32, %v1235_v52  ;;  %1450 = vadd.xlane.f32.xlu1 %v1395_v25 }
 0x2e1   : > { %v3229_v43 = vmax.f32 %v1241_v19, 0.0  ;;  %1448 = vadd.xlane.f32.xlu0 %v1394_v56 }
 0x2e2   : > { %v3231_v16 = vmax.f32 %v1236_v3, 0.0 }
 0x2e3   : > { %v1397_v47 = vmul.f32 %v3229_v43, %v3229_v43 }
 0x2e4   : > { %1358 = vadd.xlane.f32.xlu1 %v3229_v43  ;;  %v1396_v8 = vmul.f32 %v3231_v16, %v3231_v16 }
 0x2e5   : > { %1356 = vadd.xlane.f32.xlu0 %v3231_v16 }
 0x2e6   : > { %v2182_v15 = vpop.f32.mrb[26].mxu1 }
 0x2e7   : > { %v1251_v61 = vadd.f32 %v2182_v15, %v3081_v32  ;;  %v1245_v29 = vpop.f32.mrb[27].mxu1 }
 0x2e8   : > { %v1246_v57 = vadd.f32 %v3081_v32, %v1245_v29  ;;  %1454 = vadd.xlane.f32.xlu1 %v1397_v47 }
 0x2e9   : > { %v3241_v6 = vmax.f32 %v1251_v61, 0.0  ;;  %1452 = vadd.xlane.f32.xlu0 %v1396_v8 }
 0x2ea   : > { %v3243_v51 = vmax.f32 %v1246_v57, 0.0 }
 0x2eb   : > { %v1399_v50 = vmul.f32 %v3241_v6, %v3241_v6 }
 0x2ec   : > { %1362 = vadd.xlane.f32.xlu1 %v3241_v6  ;;  %v1398_v58 = vmul.f32 %v3243_v51, %v3243_v51 }
 0x2ed   : > { %1360 = vadd.xlane.f32.xlu0 %v3243_v51 }
 0x2ee   : > { %v2185_v36 = vpop.f32.mrb[28].mxu1 }
 0x2ef   : > { %v1261_v42 = vadd.f32 %v2185_v36, %v3081_v32  ;;  %v1255_v41 = vpop.f32.mrb[29].mxu1 }
 0x2f0   : > { %v1256_v30 = vadd.f32 %v3081_v32, %v1255_v41  ;;  %1458 = vadd.xlane.f32.xlu1 %v1399_v50 }
 0x2f1   : > { %v3253_v28 = vmax.f32 %v1261_v42, 0.0  ;;  %1456 = vadd.xlane.f32.xlu0 %v1398_v58 }
 0x2f2   : > { %v3255_v55 = vmax.f32 %v1256_v30, 0.0 }
 0x2f3   : > { %v1401_v7 = vmul.f32 %v3253_v28, %v3253_v28 }
 0x2f4   : > { %1366 = vadd.xlane.f32.xlu1 %v3253_v28  ;;  %v1400_v54 = vmul.f32 %v3255_v55, %v3255_v55 }
 0x2f5   : > { %1364 = vadd.xlane.f32.xlu0 %v3255_v55 }
 0x2f6   : > { %v2188_v2 = vpop.f32.mrb[30].mxu1 }
 0x2f7   : > { %v1271_v23 = vadd.f32 %v2188_v2, %v3081_v32  ;;  %v1265_v5 = vpop.f32.mrb[31].mxu1 }
 0x2f8   : > { %v1266_v49 = vadd.f32 %v3081_v32, %v1265_v5  ;;  %1462 = vadd.xlane.f32.xlu1 %v1401_v7 }
 0x2f9   : > { %v3265_v37 = vmax.f32 %v1271_v23, 0.0  ;;  %1460 = vadd.xlane.f32.xlu0 %v1400_v54 }
 0x2fa   : > { %v3267_v9 = vmax.f32 %v1266_v49, 0.0 }
 0x2fb   : > { %v1403_v53 = vmul.f32 %v3265_v37, %v3265_v37 }
 0x2fc   : > { %1370 = vadd.xlane.f32.xlu1 %v3265_v37  ;;  %v1402_v35 = vmul.f32 %v3267_v9, %v3267_v9 }
 0x2fd   : > { %1368 = vadd.xlane.f32.xlu0 %v3267_v9 }
 0x300   : > { %1466 = vadd.xlane.f32.xlu1 %v1403_v53 }
 0x301   : > { %1464 = vadd.xlane.f32.xlu0 %v1402_v35 }
 0x311   : > { %v1311_v24 = vpop.xlane.xlu1 %1310 }
 0x312   : > { %v1469_v32 = vmul.f32 0.0078125, %v1311_v24  ;;  %v1309_v10 = vpop.xlane.xlu0 %1308 }
 0x313   : > { %v1468_v44 = vmul.f32 0.0078125, %v1309_v10 }
 0x314   : > { %v1533_v18 = vmul.f32 %v1469_v32, %v1469_v32  ;;  %v1597_v24 = vsub.f32 %v3085_v60, %v1469_v32 }
 0x315   : > { %v1407_v22 = vpop.xlane.xlu1 %1406  ;;  %v1532_v19 = vmul.f32 %v1468_v44, %v1468_v44 }
 0x316   : > { %v1501_v12 = vmul.f32 0.0078125, %v1407_v22  ;;  %v1405_v25 = vpop.xlane.xlu0 %1404 }
 0x317   : > { %v1500_v52 = vmul.f32 0.0078125, %v1405_v25 }
 0x318   : > { %v1565_v56 = vsub.f32 %v1501_v12, %v1533_v18  ;;  %v1596_v18 = vsub.f32 %v3087_v11, %v1468_v44  ;;  %v3292_v12 = vld [vmem:[%s3599_s4 + $0x1] ss:$0 sm:$0xff]  ;;  %v3301_v11 = vld [vmem:[%s3599_s4 + $0x2] ss:$0 sm:$0xff] }
 0x319   : > { %v1564_v3 = vsub.f32 %v1500_v52, %v1532_v19  ;;  %v1315_v15 = vpop.xlane.xlu1 %1314 }
 0x31a   : > { %v1629_v47 = vadd.f32 1e-05, %v1565_v56  ;;  %v3275_v61 = vmul.f32 0.0078125, %v1315_v15  ;;  %v1313_v29 = vpop.xlane.xlu0 %1312 }
 0x31b   : > { %v1628_v8 = vadd.f32 1e-05, %v1564_v3  ;;  %v3277_v57 = vmul.f32 0.0078125, %v1313_v29 }
 0x31c   : > { %2325 = vrsqrt.f32 %v1629_v47  ;;  %v1535_v50 = vmul.f32 %v3275_v61, %v3275_v61 }
 0x31d   : > { %2327 = vrsqrt.f32 %v1628_v8  ;;  %v1411_v36 = vpop.xlane.xlu1 %1410  ;;  %v1534_v58 = vmul.f32 %v3277_v57, %v3277_v57 }
 0x31e   : > { %v1503_v42 = vmul.f32 0.0078125, %v1411_v36  ;;  %v1409_v41 = vpop.xlane.xlu0 %1408 }
 0x31f   : > { %v1502_v30 = vmul.f32 0.0078125, %v1409_v41 }
 0x320   : > { %v1567_v2 = vsub.f32 %v1503_v42, %v1535_v50 }
 0x321   : > { %v1566_v7 = vsub.f32 %v1502_v30, %v1534_v58  ;;  %v1319_v23 = vpop.xlane.xlu1 %1318 }
 0x322   : > { %v1631_v5 = vadd.f32 1e-05, %v1567_v2  ;;  %v3283_v54 = vmul.f32 0.0078125, %v1319_v23  ;;  %v1317_v49 = vpop.xlane.xlu0 %1316  ;;  %v2389_v23 = vld [vmem:[%s2499_s15 + $0x8] sm:$0xff] }
 0x323   : > { %v1630_v53 = vadd.f32 1e-05, %v1566_v7  ;;  %v3285_v35 = vmul.f32 0.0078125, %v1317_v49  ;;  %v1599_v49 = vsub.f32 %v3097_v17, %v3275_v61 }
 0x324   : > { %2329 = vrsqrt.f32 %v1631_v5  ;;  %v1537_v25 = vmul.f32 %v3283_v54, %v3283_v54 }
 0x325   : > { %2331 = vrsqrt.f32 %v1630_v53  ;;  %v1415_v10 = vpop.xlane.xlu1 %1414  ;;  %v1536_v60 = vmul.f32 %v3285_v35, %v3285_v35 }
 0x326   : > { %v2326_v22 = vpop.eup %2325  ;;  %v1505_v19 = vmul.f32 0.0078125, %v1415_v10  ;;  %v1413_v52 = vpop.xlane.xlu0 %1412  ;;  %v2390_v10 = vld [vmem:[%s2499_s15] sm:$0xff] }
 0x327   : > { %v2328_v56 = vpop.eup %2327  ;;  %v1693_v3 = vmul.f32 %v2326_v22, %v1597_v24  ;;  %v1504_v32 = vmul.f32 0.0078125, %v1413_v52 }
 0x328   : > { %v1692_v44 = vmul.f32 %v2328_v56, %v1596_v18  ;;  %v1569_v15 = vsub.f32 %v1505_v19, %v1537_v25  ;;  %v1598_v18 = vsub.f32 %v3099_v45, %v3277_v57 }
 0x329   : > { %v1729_v47 = vmul.f32 %v3292_v12, %v1693_v3  ;;  %v1568_v29 = vsub.f32 %v1504_v32, %v1536_v60  ;;  %v1323_v8 = vpop.xlane.xlu1 %1322 }
 0x32a   : > { %v1728_v36 = vmul.f32 %v3292_v12, %v1692_v44  ;;  %v1633_v50 = vadd.f32 1e-05, %v1569_v15  ;;  %v3305_v42 = vmul.f32 0.0078125, %v1323_v8  ;;  %v1321_v41 = vpop.xlane.xlu0 %1320 }
 0x32b   : > { %v1765_v58 = vadd.f32 %v3301_v11, %v1729_v47  ;;  %v1632_v30 = vadd.f32 1e-05, %v1568_v29  ;;  %v3308_v2 = vmul.f32 0.0078125, %v1321_v41 }
 0x32c   : > { %v1764_v7 = vadd.f32 %v3301_v11, %v1728_v36  ;;  %2333 = vrsqrt.f32 %v1633_v50  ;;  %v1539_v25 = vmul.f32 %v3305_v42, %v3305_v42 }
 0x32d   : > { %v1797_v5 = vadd.f32 %v2389_v23, %v1765_v58  ;;  %2335 = vrsqrt.f32 %v1632_v30  ;;  %v1419_v53 = vpop.xlane.xlu1 %1418  ;;  %v1538_v60 = vmul.f32 %v3308_v2, %v3308_v2  ;;  %v2391_v30 = vld [vmem:[%s2499_s15 + $0x18] sm:$0xff]  ;;  %v1601_v23 = vsub.f32 %v3109_v20, %v3283_v54 }
 0x32e   : > { %v2330_v24 = vpop.eup %2329  ;;  %v1796_v22 = vadd.f32 %v2390_v10, %v1764_v7  ;;  %v1507_v19 = vmul.f32 0.0078125, %v1419_v53  ;;  %v1417_v52 = vpop.xlane.xlu0 %1416  ;;  %v2392_v53 = vld [vmem:[%s2499_s15 + $0x10] sm:$0xff]  ;;  %v1600_v10 = vsub.f32 %v3111_v59, %v3285_v35 }
 0x32f   : > { %v2332_v56 = vpop.eup %2331  ;;  %1829 = vst [vmem:[%s3315_s14 + $0x8] sm:$0xff] %v1797_v5  ;;  %v1695_v3 = vmul.f32 %v2330_v24, %v1599_v49  ;;  %v1506_v17 = vmul.f32 0.0078125, %v1417_v52 }
 0x330   : > { %1828 = vst [vmem:[%s3315_s14] sm:$0xff] %v1796_v22  ;;  %v1694_v61 = vmul.f32 %v2332_v56, %v1598_v18  ;;  %v1571_v32 = vsub.f32 %v1507_v19, %v1539_v25 }
 0x331   : > { %v1731_v44 = vmul.f32 %v3292_v12, %v1695_v3  ;;  %v1570_v15 = vsub.f32 %v1506_v17, %v1538_v60  ;;  %v1327_v45 = vpop.xlane.xlu1 %1326 }
 0x332   : > { %v1730_v57 = vmul.f32 %v3292_v12, %v1694_v61  ;;  %v1635_v47 = vadd.f32 1e-05, %v1571_v32  ;;  %v3332_v29 = vmul.f32 0.0078125, %v1327_v45  ;;  %v1325_v8 = vpop.xlane.xlu0 %1324 }
 0x333   : > { %v1767_v36 = vadd.f32 %v3301_v11, %v1731_v44  ;;  %v1634_v50 = vadd.f32 1e-05, %v1570_v15  ;;  %v3335_v41 = vmul.f32 0.0078125, %v1325_v8  ;;  %v2393_v8 = vld [vmem:[%s2499_s15 + $0x28] sm:$0xff] }
 0x334   : > { %v1766_v58 = vadd.f32 %v3301_v11, %v1730_v57  ;;  %2337 = vrsqrt.f32 %v1635_v47  ;;  %v1541_v22 = vmul.f32 %v3332_v29, %v3332_v29 }
 0x335   : > { %v1799_v7 = vadd.f32 %v2391_v30, %v1767_v36  ;;  %2339 = vrsqrt.f32 %v1634_v50  ;;  %v1423_v5 = vpop.xlane.xlu1 %1422  ;;  %v1540_v56 = vmul.f32 %v3335_v41, %v3335_v41  ;;  %v1603_v50 = vsub.f32 %v3121_v4, %v3305_v42 }
 0x336   : > { %v2334_v49 = vpop.eup %2333  ;;  %v1798_v24 = vadd.f32 %v2392_v53, %v1766_v58  ;;  %v1509_v18 = vmul.f32 0.0078125, %v1423_v5  ;;  %v1421_v25 = vpop.xlane.xlu0 %1420  ;;  %v1602_v5 = vsub.f32 %v3123_v62, %v3308_v2 }
 0x337   : > { %v2336_v19 = vpop.eup %2335  ;;  %1831 = vst [vmem:[%s3315_s14 + $0x18] sm:$0xff] %v1799_v7  ;;  %v1697_v52 = vmul.f32 %v2334_v49, %v1601_v23  ;;  %v1508_v20 = vmul.f32 0.0078125, %v1421_v25  ;;  %v2394_v7 = vld [vmem:[%s2499_s15 + $0x20] sm:$0xff] }
 0x338   : > { %1830 = vst [vmem:[%s3315_s14 + $0x10] sm:$0xff] %v1798_v24  ;;  %v1696_v54 = vmul.f32 %v2336_v19, %v1600_v10  ;;  %v1573_v3 = vsub.f32 %v1509_v18, %v1541_v22 }
 0x339   : > { %v1733_v60 = vmul.f32 %v3292_v12, %v1697_v52  ;;  %v1572_v17 = vsub.f32 %v1508_v20, %v1540_v56  ;;  %v1331_v59 = vpop.xlane.xlu1 %1330 }
 0x33a   : > { %v1732_v35 = vmul.f32 %v3292_v12, %v1696_v54  ;;  %v1637_v61 = vadd.f32 1e-05, %v1573_v3  ;;  %v3352_v32 = vmul.f32 0.0078125, %v1331_v59  ;;  %v1329_v44 = vpop.xlane.xlu0 %1328 }
 0x33b   : > { %v1769_v15 = vadd.f32 %v3301_v11, %v1733_v60  ;;  %v1636_v45 = vadd.f32 1e-05, %v1572_v17  ;;  %v3355_v57 = vmul.f32 0.0078125, %v1329_v44  ;;  %v1605_v44 = vsub.f32 %v3133_v14, %v3332_v29 }
 0x33c   : > { %v1768_v47 = vadd.f32 %v3301_v11, %v1732_v35  ;;  %2341 = vrsqrt.f32 %v1637_v61  ;;  %v1543_v49 = vmul.f32 %v3352_v32, %v3352_v32  ;;  %v2395_v35 = vld [vmem:[%s2499_s15 + $0x38] sm:$0xff] }
 0x33d   : > { %v1801_v36 = vadd.f32 %v2393_v8, %v1769_v15  ;;  %2343 = vrsqrt.f32 %v1636_v45  ;;  %v1427_v58 = vpop.xlane.xlu1 %1426  ;;  %v1542_v18 = vmul.f32 %v3355_v57, %v3355_v57 }
 0x33e   : > { %v2338_v30 = vpop.eup %2337  ;;  %v1800_v23 = vadd.f32 %v2394_v7, %v1768_v47  ;;  %v1511_v53 = vmul.f32 0.0078125, %v1427_v58  ;;  %v1425_v24 = vpop.xlane.xlu0 %1424  ;;  %v2396_v47 = vld [vmem:[%s2499_s15 + $0x30] sm:$0xff] }
 0x33f   : > { %v2340_v10 = vpop.eup %2339  ;;  %1833 = vst [vmem:[%s3315_s14 + $0x28] sm:$0xff] %v1801_v36  ;;  %v1699_v22 = vmul.f32 %v2338_v30, %v1603_v50  ;;  %v1510_v4 = vmul.f32 0.0078125, %v1425_v24  ;;  %v1604_v36 = vsub.f32 %v3135_v33, %v3335_v41 }
 0x340   : > { %1832 = vst [vmem:[%s3315_s14 + $0x20] sm:$0xff] %v1800_v23  ;;  %v1698_v42 = vmul.f32 %v2340_v10, %v1602_v5  ;;  %v1575_v25 = vsub.f32 %v1511_v53, %v1543_v49 }
 0x341   : > { %v1735_v19 = vmul.f32 %v3292_v12, %v1699_v22  ;;  %v1574_v52 = vsub.f32 %v1510_v4, %v1542_v18  ;;  %v1335_v62 = vpop.xlane.xlu1 %1334 }
 0x342   : > { %v1734_v2 = vmul.f32 %v3292_v12, %v1698_v42  ;;  %v1639_v56 = vadd.f32 1e-05, %v1575_v25  ;;  %v3372_v20 = vmul.f32 0.0078125, %v1335_v62  ;;  %v1333_v54 = vpop.xlane.xlu0 %1332 }
 0x343   : > { %v1771_v3 = vadd.f32 %v3301_v11, %v1735_v19  ;;  %v1638_v60 = vadd.f32 1e-05, %v1574_v52  ;;  %v3375_v17 = vmul.f32 0.0078125, %v1333_v54  ;;  %v2397_v52 = vld [vmem:[%s2499_s15 + $0x48] sm:$0xff] }
 0x344   : > { %v1770_v59 = vadd.f32 %v3301_v11, %v1734_v2  ;;  %2345 = vrsqrt.f32 %v1639_v56  ;;  %v1545_v50 = vmul.f32 %v3372_v20, %v3372_v20  ;;  %v1607_v2 = vsub.f32 %v3145_v38, %v3352_v32 }
 0x345   : > { %v1803_v61 = vadd.f32 %v2395_v35, %v1771_v3  ;;  %2347 = vrsqrt.f32 %v1638_v60  ;;  %v1431_v15 = vpop.xlane.xlu1 %1430  ;;  %v1544_v5 = vmul.f32 %v3375_v17, %v3375_v17  ;;  %v2398_v3 = vld [vmem:[%s2499_s15 + $0x40] sm:$0xff] }
 0x346   : > { %v2342_v45 = vpop.eup %2341  ;;  %v1802_v8 = vadd.f32 %v2396_v47, %v1770_v59  ;;  %v1513_v58 = vmul.f32 0.0078125, %v1431_v15  ;;  %v1429_v30 = vpop.xlane.xlu0 %1428  ;;  %v1606_v59 = vsub.f32 %v3147_v48, %v3355_v57 }
 0x347   : > { %v2344_v7 = vpop.eup %2343  ;;  %1835 = vst [vmem:[%s3315_s14 + $0x38] sm:$0xff] %v1803_v61  ;;  %v1701_v23 = vmul.f32 %v2342_v45, %v1605_v44  ;;  %v1512_v14 = vmul.f32 0.0078125, %v1429_v30 }
 0x348   : > { %1834 = vst [vmem:[%s3315_s14 + $0x30] sm:$0xff] %v1802_v8  ;;  %v1700_v29 = vmul.f32 %v2344_v7, %v1604_v36  ;;  %v1577_v49 = vsub.f32 %v1513_v58, %v1545_v50 }
 0x349   : > { %v1737_v53 = vmul.f32 %v3292_v12, %v1701_v23  ;;  %v1576_v24 = vsub.f32 %v1512_v14, %v1544_v5  ;;  %v1339_v33 = vpop.xlane.xlu1 %1338 }
 0x34a   : > { %v1736_v41 = vmul.f32 %v3292_v12, %v1700_v29  ;;  %v1641_v10 = vadd.f32 1e-05, %v1577_v49  ;;  %v3392_v22 = vmul.f32 0.0078125, %v1339_v33  ;;  %v1337_v18 = vpop.xlane.xlu0 %1336  ;;  %v2399_v49 = vld [vmem:[%s2499_s15 + $0x58] sm:$0xff] }
 0x34b   : > { %v1773_v4 = vadd.f32 %v3301_v11, %v1737_v53  ;;  %v1640_v42 = vadd.f32 1e-05, %v1576_v24  ;;  %v3395_v25 = vmul.f32 0.0078125, %v1337_v18  ;;  %v1609_v24 = vsub.f32 %v3157_v39, %v3372_v20 }
 0x34c   : > { %v1772_v19 = vadd.f32 %v3301_v11, %v1736_v41  ;;  %2349 = vrsqrt.f32 %v1641_v10  ;;  %v1547_v35 = vmul.f32 %v3392_v22, %v3392_v22  ;;  %v2400_v10 = vld [vmem:[%s2499_s15 + $0x50] sm:$0xff] }
 0x34d   : > { %v1805_v62 = vadd.f32 %v2397_v52, %v1773_v4  ;;  %2351 = vrsqrt.f32 %v1640_v42  ;;  %v1435_v56 = vpop.xlane.xlu1 %1434  ;;  %v1546_v47 = vmul.f32 %v3395_v25, %v3395_v25  ;;  %v1608_v4 = vsub.f32 %v3159_v27, %v3375_v17 }
 0x34e   : > { %v2346_v54 = vpop.eup %2345  ;;  %v1804_v60 = vadd.f32 %v2398_v3, %v1772_v19  ;;  %v1515_v61 = vmul.f32 0.0078125, %v1435_v56  ;;  %v1433_v44 = vpop.xlane.xlu0 %1432 }
 0x34f   : > { %v2348_v15 = vpop.eup %2347  ;;  %1837 = vst [vmem:[%s3315_s14 + $0x48] sm:$0xff] %v1805_v62  ;;  %v1703_v45 = vmul.f32 %v2346_v54, %v1607_v2  ;;  %v1514_v38 = vmul.f32 0.0078125, %v1433_v44 }
 0x350   : > { %1836 = vst [vmem:[%s3315_s14 + $0x40] sm:$0xff] %v1804_v60  ;;  %v1702_v32 = vmul.f32 %v2348_v15, %v1606_v59  ;;  %v1579_v8 = vsub.f32 %v1515_v61, %v1547_v35 }
 0x351   : > { %v1739_v36 = vmul.f32 %v3292_v12, %v1703_v45  ;;  %v1578_v50 = vsub.f32 %v1514_v38, %v1546_v47  ;;  %v1343_v48 = vpop.xlane.xlu1 %1342  ;;  %v2401_v38 = vld [vmem:[%s2499_s15 + $0x68] sm:$0xff] }
 0x352   : > { %v1738_v57 = vmul.f32 %v3292_v12, %v1702_v32  ;;  %v1643_v58 = vadd.f32 1e-05, %v1579_v8  ;;  %v3412_v30 = vmul.f32 0.0078125, %v1343_v48  ;;  %v1341_v7 = vpop.xlane.xlu0 %1340  ;;  %v1611_v8 = vsub.f32 %v3169_v26, %v3392_v22  ;;  %v2402_v48 = vld [vmem:[%s2499_s15 + $0x60] sm:$0xff] }
 0x353   : > { %v1775_v23 = vadd.f32 %v3301_v11, %v1739_v36  ;;  %v1642_v5 = vadd.f32 1e-05, %v1578_v50  ;;  %v3415_v14 = vmul.f32 0.0078125, %v1341_v7 }
 0x354   : > { %v1774_v29 = vadd.f32 %v3301_v11, %v1738_v57  ;;  %2353 = vrsqrt.f32 %v1643_v58  ;;  %v1549_v42 = vmul.f32 %v3412_v30, %v3412_v30  ;;  %v1610_v58 = vsub.f32 %v3171_v34, %v3395_v25 }
 0x355   : > { %v1807_v53 = vadd.f32 %v2399_v49, %v1775_v23  ;;  %2355 = vrsqrt.f32 %v1642_v5  ;;  %v1439_v33 = vpop.xlane.xlu1 %1438  ;;  %v1548_v56 = vmul.f32 %v3415_v14, %v3415_v14 }
 0x356   : > { %v2350_v41 = vpop.eup %2349  ;;  %v1806_v18 = vadd.f32 %v2400_v10, %v1774_v29  ;;  %v1517_v19 = vmul.f32 0.0078125, %v1439_v33  ;;  %v1437_v52 = vpop.xlane.xlu0 %1436 }
 0x357   : > { %v2352_v62 = vpop.eup %2351  ;;  %1839 = vst [vmem:[%s3315_s14 + $0x58] sm:$0xff] %v1807_v53  ;;  %v1705_v2 = vmul.f32 %v2350_v41, %v1609_v24  ;;  %v1516_v39 = vmul.f32 0.0078125, %v1437_v52 }
 0x358   : > { %1838 = vst [vmem:[%s3315_s14 + $0x50] sm:$0xff] %v1806_v18  ;;  %v1704_v20 = vmul.f32 %v2352_v62, %v1608_v4  ;;  %v1581_v54 = vsub.f32 %v1517_v19, %v1549_v42 }
 0x359   : > { %v1741_v3 = vmul.f32 %v3292_v12, %v1705_v2  ;;  %v1580_v60 = vsub.f32 %v1516_v39, %v1548_v56  ;;  %v1347_v27 = vpop.xlane.xlu1 %1346  ;;  %v2403_v2 = vld [vmem:[%s2499_s15 + $0x78] sm:$0xff]  ;;  %v1613_v39 = vsub.f32 %v3181_v0, %v3412_v30 }
 0x35a   : > { %v1740_v17 = vmul.f32 %v3292_v12, %v1704_v20  ;;  %v1645_v59 = vadd.f32 1e-05, %v1581_v54  ;;  %v3432_v35 = vmul.f32 0.0078125, %v1347_v27  ;;  %v1345_v61 = vpop.xlane.xlu0 %1344  ;;  %v1612_v27 = vsub.f32 %v3183_v1, %v3415_v14 }
 0x35b   : > { %v1777_v44 = vadd.f32 %v3301_v11, %v1741_v3  ;;  %v1644_v15 = vadd.f32 1e-05, %v1580_v60  ;;  %v3435_v45 = vmul.f32 0.0078125, %v1345_v61  ;;  %v2404_v3 = vld [vmem:[%s2499_s15 + $0x70] sm:$0xff] }
 0x35c   : > { %v1776_v47 = vadd.f32 %v3301_v11, %v1740_v17  ;;  %2357 = vrsqrt.f32 %v1645_v59  ;;  %v1551_v7 = vmul.f32 %v3432_v35, %v3432_v35 }
 0x35d   : > { %v1809_v32 = vadd.f32 %v2401_v38, %v1777_v44  ;;  %2359 = vrsqrt.f32 %v1644_v15  ;;  %v1443_v36 = vpop.xlane.xlu1 %1442  ;;  %v1550_v53 = vmul.f32 %v3435_v45, %v3435_v45 }
 0x35e   : > { %v2354_v50 = vpop.eup %2353  ;;  %v1808_v57 = vadd.f32 %v2402_v48, %v1776_v47  ;;  %v1519_v23 = vmul.f32 0.0078125, %v1443_v36  ;;  %v1441_v5 = vpop.xlane.xlu0 %1440 }
 0x35f   : > { %v2356_v29 = vpop.eup %2355  ;;  %1841 = vst [vmem:[%s3315_s14 + $0x68] sm:$0xff] %v1809_v32  ;;  %v1707_v49 = vmul.f32 %v2354_v50, %v1611_v8  ;;  %v1518_v26 = vmul.f32 0.0078125, %v1441_v5  ;;  %v2405_v5 = vld [vmem:[%s2499_s15 + $0x88] sm:$0xff] }
 0x360   : > { %1840 = vst [vmem:[%s3315_s14 + $0x60] sm:$0xff] %v1808_v57  ;;  %v1706_v22 = vmul.f32 %v2356_v29, %v1610_v58  ;;  %v1583_v24 = vsub.f32 %v1519_v23, %v1551_v7 }
 0x361   : > { %v1743_v33 = vmul.f32 %v3292_v12, %v1707_v49  ;;  %v1582_v41 = vsub.f32 %v1518_v26, %v1550_v53  ;;  %v1351_v34 = vpop.xlane.xlu1 %1350  ;;  %v1615_v49 = vsub.f32 %v3193_v63, %v3432_v35 }
 0x362   : > { %v1742_v25 = vmul.f32 %v3292_v12, %v1706_v22  ;;  %v1647_v10 = vadd.f32 1e-05, %v1583_v24  ;;  %v3452_v18 = vmul.f32 0.0078125, %v1351_v34  ;;  %v1349_v4 = vpop.xlane.xlu0 %1348  ;;  %v2406_v22 = vld [vmem:[%s2499_s15 + $0x80] sm:$0xff] }
 0x363   : > { %v1779_v42 = vadd.f32 %v3301_v11, %v1743_v33  ;;  %v1646_v19 = vadd.f32 1e-05, %v1582_v41  ;;  %v3455_v52 = vmul.f32 0.0078125, %v1349_v4  ;;  %v1614_v33 = vsub.f32 %v3195_v46, %v3435_v45 }
 0x364   : > { %v1778_v62 = vadd.f32 %v3301_v11, %v1742_v25  ;;  %2361 = vrsqrt.f32 %v1647_v10  ;;  %v1553_v17 = vmul.f32 %v3452_v18, %v3452_v18 }
 0x365   : > { %v1811_v56 = vadd.f32 %v2403_v2, %v1779_v42  ;;  %2363 = vrsqrt.f32 %v1646_v19  ;;  %v1447_v20 = vpop.xlane.xlu1 %1446  ;;  %v1552_v47 = vmul.f32 %v3455_v52, %v3455_v52 }
 0x366   : > { %v2358_v54 = vpop.eup %2357  ;;  %v1810_v60 = vadd.f32 %v2404_v3, %v1778_v62  ;;  %v1521_v59 = vmul.f32 0.0078125, %v1447_v20  ;;  %v1445_v61 = vpop.xlane.xlu0 %1444 }
 0x367   : > { %v2360_v44 = vpop.eup %2359  ;;  %1843 = vst [vmem:[%s3315_s14 + $0x78] sm:$0xff] %v1811_v56  ;;  %v1709_v15 = vmul.f32 %v2358_v54, %v1613_v39  ;;  %v1520_v0 = vmul.f32 0.0078125, %v1445_v61  ;;  %v1617_v61 = vsub.f32 %v3205_v13, %v3452_v18 }
 0x368   : > { %1842 = vst [vmem:[%s3315_s14 + $0x70] sm:$0xff] %v1810_v60  ;;  %v1708_v30 = vmul.f32 %v2360_v44, %v1612_v27  ;;  %v1585_v38 = vsub.f32 %v1521_v59, %v1553_v17  ;;  %v2407_v17 = vld [vmem:[%s2499_s15 + $0x98] sm:$0xff] }
 0x369   : > { %v1745_v32 = vmul.f32 %v3292_v12, %v1709_v15  ;;  %v1584_v8 = vsub.f32 %v1520_v0, %v1552_v47  ;;  %v1355_v1 = vpop.xlane.xlu1 %1354  ;;  %v2408_v47 = vld [vmem:[%s2499_s15 + $0x90] sm:$0xff] }
 0x36a   : > { %v1744_v14 = vmul.f32 %v3292_v12, %v1708_v30  ;;  %v1649_v36 = vadd.f32 1e-05, %v1585_v38  ;;  %v3472_v50 = vmul.f32 0.0078125, %v1355_v1  ;;  %v1353_v48 = vpop.xlane.xlu0 %1352  ;;  %v1616_v30 = vsub.f32 %v3207_v21, %v3455_v52 }
 0x36b   : > { %v1781_v57 = vadd.f32 %v3301_v11, %v1745_v32  ;;  %v1648_v58 = vadd.f32 1e-05, %v1584_v8  ;;  %v3475_v7 = vmul.f32 0.0078125, %v1353_v48 }
 0x36c   : > { %v1780_v23 = vadd.f32 %v3301_v11, %v1744_v14  ;;  %2365 = vrsqrt.f32 %v1649_v36  ;;  %v1555_v41 = vmul.f32 %v3472_v50, %v3472_v50 }
 0x36d   : > { %v1813_v29 = vadd.f32 %v2405_v5, %v1781_v57  ;;  %2367 = vrsqrt.f32 %v1648_v58  ;;  %v1451_v53 = vpop.xlane.xlu1 %1450  ;;  %v1554_v42 = vmul.f32 %v3475_v7, %v3475_v7 }
 0x36e   : > { %v2362_v26 = vpop.eup %2361  ;;  %v1812_v24 = vadd.f32 %v2406_v22, %v1780_v23  ;;  %v1523_v34 = vmul.f32 0.0078125, %v1451_v53  ;;  %v1449_v25 = vpop.xlane.xlu0 %1448 }
 0x36f   : > { %v2364_v10 = vpop.eup %2363  ;;  %1845 = vst [vmem:[%s3315_s14 + $0x88] sm:$0xff] %v1813_v29  ;;  %v1711_v4 = vmul.f32 %v2362_v26, %v1615_v49  ;;  %v1522_v63 = vmul.f32 0.0078125, %v1449_v25 }
 0x370   : > { %1844 = vst [vmem:[%s3315_s14 + $0x80] sm:$0xff] %v1812_v24  ;;  %v1710_v35 = vmul.f32 %v2364_v10, %v1614_v33  ;;  %v1587_v19 = vsub.f32 %v1523_v34, %v1555_v41  ;;  %v2409_v24 = vld [vmem:[%s2499_s15 + $0xa8] sm:$0xff]  ;;  %v1619_v41 = vsub.f32 %v3217_v31, %v3472_v50  ;;  %v2410_v10 = vld [vmem:[%s2499_s15 + $0xa0] sm:$0xff] }
 0x371   : > { %v1747_v62 = vmul.f32 %v3292_v12, %v1711_v4  ;;  %v1586_v2 = vsub.f32 %v1522_v63, %v1554_v42  ;;  %v1359_v46 = vpop.xlane.xlu1 %1358  ;;  %v1618_v42 = vsub.f32 %v3219_v40, %v3475_v7 }
 0x372   : > { %v1746_v45 = vmul.f32 %v3292_v12, %v1710_v35  ;;  %v1651_v56 = vadd.f32 1e-05, %v1587_v19  ;;  %v3492_v39 = vmul.f32 0.0078125, %v1359_v46  ;;  %v1357_v20 = vpop.xlane.xlu0 %1356 }
 0x373   : > { %v1783_v54 = vadd.f32 %v3301_v11, %v1747_v62  ;;  %v1650_v3 = vadd.f32 1e-05, %v1586_v2  ;;  %v3495_v60 = vmul.f32 0.0078125, %v1357_v20 }
 0x374   : > { %v1782_v27 = vadd.f32 %v3301_v11, %v1746_v45  ;;  %2369 = vrsqrt.f32 %v1651_v56  ;;  %v1557_v38 = vmul.f32 %v3492_v39, %v3492_v39 }
 0x375   : > { %v1815_v59 = vadd.f32 %v2407_v17, %v1783_v54  ;;  %2371 = vrsqrt.f32 %v1650_v3  ;;  %v1455_v44 = vpop.xlane.xlu1 %1454  ;;  %v1556_v36 = vmul.f32 %v3495_v60, %v3495_v60 }
 0x376   : > { %v2366_v15 = vpop.eup %2365  ;;  %v1814_v0 = vadd.f32 %v2408_v47, %v1782_v27  ;;  %v1525_v32 = vmul.f32 0.0078125, %v1455_v44  ;;  %v1453_v8 = vpop.xlane.xlu0 %1452 }
 0x377   : > { %v2368_v1 = vpop.eup %2367  ;;  %1847 = vst [vmem:[%s3315_s14 + $0x98] sm:$0xff] %v1815_v59  ;;  %v1713_v14 = vmul.f32 %v2366_v15, %v1617_v61  ;;  %v1524_v13 = vmul.f32 0.0078125, %v1453_v8  ;;  %v2411_v15 = vld [vmem:[%s2499_s15 + $0xb8] sm:$0xff] }
 0x378   : > { %1846 = vst [vmem:[%s3315_s14 + $0x90] sm:$0xff] %v1814_v0  ;;  %v1712_v18 = vmul.f32 %v2368_v1, %v1616_v30  ;;  %v1589_v48 = vsub.f32 %v1525_v32, %v1557_v38  ;;  %v1621_v0 = vsub.f32 %v3229_v43, %v3492_v39  ;;  %v2412_v32 = vld [vmem:[%s2499_s15 + $0xb0] sm:$0xff]  ;;  %v1620_v1 = vsub.f32 %v3231_v16, %v3495_v60 }
 0x379   : > { %v1749_v57 = vmul.f32 %v3292_v12, %v1713_v14  ;;  %v1588_v58 = vsub.f32 %v1524_v13, %v1556_v36  ;;  %v1363_v21 = vpop.xlane.xlu1 %1362 }
 0x37a   : > { %v1748_v52 = vmul.f32 %v3292_v12, %v1712_v18  ;;  %v1653_v23 = vadd.f32 1e-05, %v1589_v48  ;;  %v3512_v5 = vmul.f32 0.0078125, %v1363_v21  ;;  %v1361_v29 = vpop.xlane.xlu0 %1360 }
 0x37b   : > { %v1785_v49 = vadd.f32 %v3301_v11, %v1749_v57  ;;  %v1652_v53 = vadd.f32 1e-05, %v1588_v58  ;;  %v3515_v26 = vmul.f32 0.0078125, %v1361_v29 }
 0x37c   : > { %v1784_v22 = vadd.f32 %v3301_v11, %v1748_v52  ;;  %2373 = vrsqrt.f32 %v1653_v23  ;;  %v1559_v63 = vmul.f32 %v3512_v5, %v3512_v5 }
 0x37d   : > { %v1817_v33 = vadd.f32 %v2409_v24, %v1785_v49  ;;  %2375 = vrsqrt.f32 %v1652_v53  ;;  %v1459_v34 = vpop.xlane.xlu1 %1458  ;;  %v1558_v46 = vmul.f32 %v3515_v26, %v3515_v26 }
 0x37e   : > { %v2370_v25 = vpop.eup %2369  ;;  %v1816_v4 = vadd.f32 %v2410_v10, %v1784_v22  ;;  %v1527_v35 = vmul.f32 0.0078125, %v1459_v34  ;;  %v1457_v19 = vpop.xlane.xlu0 %1456 }
 0x37f   : > { %v2372_v62 = vpop.eup %2371  ;;  %1849 = vst [vmem:[%s3315_s14 + $0xa8] sm:$0xff] %v1817_v33  ;;  %v1715_v2 = vmul.f32 %v2370_v25, %v1619_v41  ;;  %v1526_v31 = vmul.f32 0.0078125, %v1457_v19  ;;  %v2413_v41 = vld [vmem:[%s2499_s15 + $0xc8] sm:$0xff]  ;;  %v1623_v25 = vsub.f32 %v3241_v6, %v3512_v5 }
 0x380   : > { %1848 = vst [vmem:[%s3315_s14 + $0xa0] sm:$0xff] %v1816_v4  ;;  %v1714_v50 = vmul.f32 %v2372_v62, %v1618_v42  ;;  %v1591_v45 = vsub.f32 %v1527_v35, %v1559_v63  ;;  %v2414_v42 = vld [vmem:[%s2499_s15 + $0xc0] sm:$0xff]  ;;  %v1622_v35 = vsub.f32 %v3243_v51, %v3515_v26 }
 0x381   : > { %v1751_v56 = vmul.f32 %v3292_v12, %v1715_v2  ;;  %v1590_v20 = vsub.f32 %v1526_v31, %v1558_v46  ;;  %v1367_v40 = vpop.xlane.xlu1 %1366 }
 0x382   : > { %v1750_v7 = vmul.f32 %v3292_v12, %v1714_v50  ;;  %v1655_v54 = vadd.f32 1e-05, %v1591_v45  ;;  %v3532_v3 = vmul.f32 0.0078125, %v1367_v40  ;;  %v1365_v27 = vpop.xlane.xlu0 %1364 }
 0x383   : > { %v1787_v17 = vadd.f32 %v3301_v11, %v1751_v56  ;;  %v1654_v59 = vadd.f32 1e-05, %v1590_v20  ;;  %v3535_v61 = vmul.f32 0.0078125, %v1365_v27  ;;  %v2415_v27 = vld [vmem:[%s2499_s15 + $0xd8] sm:$0xff] }
 0x384   : > { %v1786_v44 = vadd.f32 %v3301_v11, %v1750_v7  ;;  %2377 = vrsqrt.f32 %v1655_v54  ;;  %v1561_v14 = vmul.f32 %v3532_v3, %v3532_v3 }
 0x385   : > { %v1819_v47 = vadd.f32 %v2411_v15, %v1787_v17  ;;  %2379 = vrsqrt.f32 %v1654_v59  ;;  %v1463_v30 = vpop.xlane.xlu1 %1462  ;;  %v1560_v57 = vmul.f32 %v3535_v61, %v3535_v61  ;;  %v1625_v59 = vsub.f32 %v3253_v28, %v3532_v3  ;;  %v2416_v15 = vld [vmem:[%s2499_s15 + $0xd0] sm:$0xff] }
 0x386   : > { %v2374_v38 = vpop.eup %2373  ;;  %v1818_v8 = vadd.f32 %v2412_v32, %v1786_v44  ;;  %v1529_v36 = vmul.f32 0.0078125, %v1463_v30  ;;  %v1461_v13 = vpop.xlane.xlu0 %1460 }
 0x387   : > { %v2376_v18 = vpop.eup %2375  ;;  %1851 = vst [vmem:[%s3315_s14 + $0xb8] sm:$0xff] %v1819_v47  ;;  %v1717_v48 = vmul.f32 %v2374_v38, %v1621_v0  ;;  %v1528_v43 = vmul.f32 0.0078125, %v1461_v13  ;;  %v1624_v0 = vsub.f32 %v3255_v55, %v3535_v61  ;;  %v2418_v13 = vld [vmem:[%s2499_s15 + $0xe0] sm:$0xff] }
 0x388   : > { %1850 = vst [vmem:[%s3315_s14 + $0xb0] sm:$0xff] %v1818_v8  ;;  %v1716_v39 = vmul.f32 %v2376_v18, %v1620_v1  ;;  %v1593_v58 = vsub.f32 %v1529_v36, %v1561_v14  ;;  %v2417_v14 = vld [vmem:[%s2499_s15 + $0xe8] sm:$0xff] }
 0x389   : > { %v1753_v21 = vmul.f32 %v3292_v12, %v1717_v48  ;;  %v1592_v52 = vsub.f32 %v1528_v43, %v1560_v57  ;;  %v1371_v16 = vpop.xlane.xlu1 %1370 }
 0x38a   : > { %v1752_v60 = vmul.f32 %v3292_v12, %v1716_v39  ;;  %v1657_v23 = vadd.f32 1e-05, %v1593_v58  ;;  %v1499_v29 = vmul.f32 0.0078125, %v1371_v16  ;;  %v1369_v49 = vpop.xlane.xlu0 %1368  ;;  %v2419_v16 = vld [vmem:[%s2499_s15 + $0xf8] sm:$0xff] }
 0x38b   : > { %v1789_v53 = vadd.f32 %v3301_v11, %v1753_v21  ;;  %v1656_v22 = vadd.f32 1e-05, %v1592_v52  ;;  %v1498_v24 = vmul.f32 0.0078125, %v1369_v49 }
 0x38c   : > { %v1788_v33 = vadd.f32 %v3301_v11, %v1752_v60  ;;  %2381 = vrsqrt.f32 %v1657_v23  ;;  %v1563_v19 = vmul.f32 %v1499_v29, %v1499_v29  ;;  %v1627_v55 = vsub.f32 %v3265_v37, %v1499_v29  ;;  %v2420_v23 = vld [vmem:[%s2499_s15 + $0xf0] sm:$0xff] }
 0x38d   : > { %v1821_v34 = vadd.f32 %v2413_v41, %v1789_v53  ;;  %2383 = vrsqrt.f32 %v1656_v22  ;;  %v1467_v10 = vpop.xlane.xlu1 %1466  ;;  %v1562_v50 = vmul.f32 %v1498_v24, %v1498_v24  ;;  %v1626_v48 = vsub.f32 %v3267_v9, %v1498_v24 }
 0x38e   : > { %v2378_v4 = vpop.eup %2377  ;;  %v1820_v63 = vadd.f32 %v2414_v42, %v1788_v33  ;;  %v1531_v62 = vmul.f32 0.0078125, %v1467_v10  ;;  %v1465_v2 = vpop.xlane.xlu0 %1464 }
 0x38f   : > { %v2380_v46 = vpop.eup %2379  ;;  %1853 = vst [vmem:[%s3315_s14 + $0xc8] sm:$0xff] %v1821_v34  ;;  %v1719_v31 = vmul.f32 %v2378_v4, %v1623_v25  ;;  %v1530_v45 = vmul.f32 0.0078125, %v1465_v2 }
 0x390   : > { %1852 = vst [vmem:[%s3315_s14 + $0xc0] sm:$0xff] %v1820_v63  ;;  %v1718_v6 = vmul.f32 %v2380_v46, %v1622_v35  ;;  %v1595_v5 = vsub.f32 %v1531_v62, %v1563_v19 }
 0x391   : > { %v1755_v56 = vmul.f32 %v3292_v12, %v1719_v31  ;;  %v1594_v20 = vsub.f32 %v1530_v45, %v1562_v50 }
 0x392   : > { %v1754_v40 = vmul.f32 %v3292_v12, %v1718_v6  ;;  %v1659_v51 = vadd.f32 1e-05, %v1595_v5 }
 0x393   : > { %v1791_v26 = vadd.f32 %v3301_v11, %v1755_v56  ;;  %v1658_v7 = vadd.f32 1e-05, %v1594_v20 }
 0x394   : > { %v1790_v54 = vadd.f32 %v3301_v11, %v1754_v40  ;;  %2385 = vrsqrt.f32 %v1659_v51 }
 0x395   : > { %v1823_v17 = vadd.f32 %v2415_v27, %v1791_v26  ;;  %2387 = vrsqrt.f32 %v1658_v7 }
 0x396   : > { %v2382_v44 = vpop.eup %2381  ;;  %v1822_v47 = vadd.f32 %v2416_v15, %v1790_v54 }
 0x397   : > { %v2384_v30 = vpop.eup %2383  ;;  %1855 = vst [vmem:[%s3315_s14 + $0xd8] sm:$0xff] %v1823_v17  ;;  %v1721_v38 = vmul.f32 %v2382_v44, %v1625_v59 }
 0x398   : > { %1854 = vst [vmem:[%s3315_s14 + $0xd0] sm:$0xff] %v1822_v47  ;;  %v1720_v32 = vmul.f32 %v2384_v30, %v1624_v0 }
 0x399   : > { %v1757_v8 = vmul.f32 %v3292_v12, %v1721_v38 }
 0x39a   : > { %v1756_v1 = vmul.f32 %v3292_v12, %v1720_v32 }
 0x39b   : > { %v1793_v28 = vadd.f32 %v3301_v11, %v1757_v8 }
 0x39c   : > { %v1792_v3 = vadd.f32 %v3301_v11, %v1756_v1 }
 0x39d   : > { %v1825_v36 = vadd.f32 %v2417_v14, %v1793_v28 }
 0x39e   : > { %v2386_v61 = vpop.eup %2385  ;;  %v1824_v18 = vadd.f32 %v2418_v13, %v1792_v3 }
 0x39f   : > { %v2388_v57 = vpop.eup %2387  ;;  %1857 = vst [vmem:[%s3315_s14 + $0xe8] sm:$0xff] %v1825_v36  ;;  %v1723_v43 = vmul.f32 %v2386_v61, %v1627_v55 }
 0x3a0   : > { %1856 = vst [vmem:[%s3315_s14 + $0xe0] sm:$0xff] %v1824_v18  ;;  %v1722_v39 = vmul.f32 %v2388_v57, %v1626_v48 }
 0x3a1   : > { %v1759_v58 = vmul.f32 %v3292_v12, %v1723_v43 }
 0x3a2   : > { %v1758_v21 = vmul.f32 %v3292_v12, %v1722_v39 }
 0x3a3   : > { %v1795_v52 = vadd.f32 %v3301_v11, %v1759_v58 }
 0x3a4   : > { %v1794_v37 = vadd.f32 %v3301_v11, %v1758_v21 }
 0x3a5   : > { %v1827_v60 = vadd.f32 %v2419_v16, %v1795_v52 }
 0x3a6   : > { %v1826_v29 = vadd.f32 %v2420_v23, %v1794_v37 }
 0x3a7   : > { %1859 = vst [vmem:[%s3315_s14 + $0xf8] sm:$0xff] %v1827_v60 }
 0x3a8   : > { %1858 = vst [vmem:[%s3315_s14 + $0xf0] sm:$0xff] %v1826_v29 }
 0x3a9 PF: > { %s15_s18 = sadd.s32 1, %s2427_s18  }
 0x3aa   : > { %p12_p4 = scmp.ge.s32.totalorder %s15_s18, 4  }
 0x3ac   :  { %14 = sbr.rel (!%p12_p4) target bundleno = 1 (0x1), region = 70 }

</bundles_post_ra>
